<compile_context>
chip_gen: v6e
topology: v6e:2x2x1
jax: 0.10.0
libtpu: 0.0.40
codegen_flags: <defaults>
</compile_context>

<pallas_src>
import numpy as np
import jax
import jax.numpy as jnp
from jax.experimental import pallas as pl
from jax.experimental.pallas import tpu as pltpu

# ----------------------------- hyper-parameters -------------------------------
N_EMBD = 32
N_HEAD = 4
DIM_HEAD = N_EMBD // N_HEAD          # 8
BLOCK_EXP = 4
MLP_DIM = BLOCK_EXP * N_EMBD         # 128
N_LAYER = 2
N_VIEWS = 1
SEQ_LEN = 1
VERT, HORZ = 2, 2                    # vert_anchors, horz_anchors (== H, W of inputs)
BZ = 2
T_TOKENS = (N_VIEWS + 1) * SEQ_LEN * VERT * HORZ   # 8 tokens per batch element
SCALE = float(1.0 / np.sqrt(DIM_HEAD))
LN_EPS = 1e-5                        # torch.nn.LayerNorm default


def _layernorm(x, gamma, beta):
    mu = jnp.mean(x, axis=-1, keepdims=True)
    var = jnp.mean((x - mu) ** 2, axis=-1, keepdims=True)
    return (x - mu) * jax.lax.rsqrt(var + LN_EPS) * gamma + beta


# ------------------------------- Pallas kernel --------------------------------
def gpt_kernel(x_ref, pos_ref,
               ln1_g_ref, ln1_b_ref, wqkv_ref, bqkv_ref, wo_ref, bo_ref,
               ln2_g_ref, ln2_b_ref, w1_ref, b1_ref, w2_ref, b2_ref,
               lnf_g_ref, lnf_b_ref,
               o_ref):
    # One batch element per grid step; all layers fused below.
    x = x_ref[0] + pos_ref[...]                       # (T, D)

    for l in range(N_LAYER):                          # static unroll over depth
        # ---------------- LN1 + multi-head self-attention + residual ----------
        xn = _layernorm(x, ln1_g_ref[l], ln1_b_ref[l])            # (T, D)
        # QKV directly in head-batched layout: (3*H, T, dh). No transposes.
        xb = jnp.broadcast_to(xn, (3 * N_HEAD,) + xn.shape)       # (3H, T, D)
        qkv = jnp.einsum('gtd,gdf->gtf', xb, wqkv_ref[l],
                         preferred_element_type=jnp.float32) + bqkv_ref[l]
        q = qkv[0:N_HEAD] * SCALE                                  # (H, T, dh)
        k = qkv[N_HEAD:2 * N_HEAD]                                 # (H, T, dh)
        v = qkv[2 * N_HEAD:3 * N_HEAD]                             # (H, T, dh)

        dots = jnp.einsum('hnd,hmd->hnm', q, k,
                          preferred_element_type=jnp.float32)      # (H, T, T)
        dots = dots - jnp.max(dots, axis=-1, keepdims=True)
        e = jnp.exp(dots)
        attn = e * pl.reciprocal(jnp.sum(e, axis=-1, keepdims=True), approx=True)

        out = jnp.einsum('hnm,hmd->hnd', attn, v,
                         preferred_element_type=jnp.float32)       # (H, T, dh)
        # Head merge folded into the output projection: sum_h out_h @ Wo[h]
        proj = jnp.einsum('hnd,hde->hne', out, wo_ref[l],
                          preferred_element_type=jnp.float32)      # (H, T, D)
        x = x + jnp.sum(proj, axis=0) + bo_ref[l]                  # residual

        # ---------------- LN2 + MLP (Linear -> ReLU -> Linear) + residual -----
        xn = _layernorm(x, ln2_g_ref[l], ln2_b_ref[l])
        h1 = jnp.dot(xn, w1_ref[l], preferred_element_type=jnp.float32) + b1_ref[l]
        h1 = jnp.maximum(h1, 0.0)                                  # ReLU
        x = x + jnp.dot(h1, w2_ref[l], preferred_element_type=jnp.float32) + b2_ref[l]

    # ---------------- final LayerNorm (ln_f) -----------------------------------
    x = _layernorm(x, lnf_g_ref[...], lnf_b_ref[...])
    o_ref[0] = x


def _full_spec(shape):
    nd = len(shape)
    return pl.BlockSpec(shape, lambda b, _nd=nd: (0,) * _nd)


def transformer_stack(tokens, kparams):
    """tokens: (B, T, D). pos-emb add + all blocks + ln_f in one pallas_call."""
    b, t, d = tokens.shape
    in_specs = [pl.BlockSpec((1, t, d), lambda i: (i, 0, 0))]
    in_specs += [_full_spec(p.shape) for p in kparams]
    return pl.pallas_call(
        gpt_kernel,
        out_shape=jax.ShapeDtypeStruct(tokens.shape, tokens.dtype),
        grid_spec=pltpu.PrefetchScalarGridSpec(
            num_scalar_prefetch=0,
            grid=(b,),
            in_specs=in_specs,
            out_specs=pl.BlockSpec((1, t, d), lambda i: (i, 0, 0)),
        ),
        compiler_params=pltpu.CompilerParams(
            dimension_semantics=("parallel",)),   # v7x: shard batch across 2 TCs
    )(tokens, *kparams)


# ------------------------------ full GPT forward ------------------------------
@jax.jit
def gpt_forward(image_tensor, lidar_tensor, kparams):
    bz = lidar_tensor.shape[0] // SEQ_LEN
    h, w = lidar_tensor.shape[2], lidar_tensor.shape[3]
    img = image_tensor.reshape(bz, N_VIEWS * SEQ_LEN, -1, h, w)
    lid = lidar_tensor.reshape(bz, SEQ_LEN, -1, h, w)
    tok = jnp.concatenate([img, lid], axis=1)                 # (bz, S, C, h, w)
    tok = jnp.transpose(tok, (0, 1, 3, 4, 2))                 # (bz, S, h, w, C)
    tok = tok.reshape(bz, -1, N_EMBD)                         # (bz, T, C)

    x = transformer_stack(tok, kparams)                       # (bz, T, C)

    x = x.reshape(bz, (N_VIEWS + 1) * SEQ_LEN, VERT, HORZ, N_EMBD)
    x = jnp.transpose(x, (0, 1, 4, 2, 3))                     # (bz, S, C, h, w)
    img_out = x[:, :N_VIEWS * SEQ_LEN].reshape(bz * N_VIEWS * SEQ_LEN, N_EMBD, h, w)
    lid_out = x[:, N_VIEWS * SEQ_LEN:].reshape(bz * SEQ_LEN, N_EMBD, h, w)
    return img_out, lid_out


# --------------------- pure-JAX reference (mirrors PyTorch) -------------------
def gpt_ref(image_tensor, lidar_tensor, params):
    bz = lidar_tensor.shape[0] // SEQ_LEN
    h, w = lidar_tensor.shape[2], lidar_tensor.shape[3]
    img = image_tensor.reshape(bz, N_VIEWS * SEQ_LEN, -1, h, w)
    lid = lidar_tensor.reshape(bz, SEQ_LEN, -1, h, w)
    tok = jnp.concatenate([img, lid], axis=1)
    tok = jnp.transpose(tok, (0, 1, 3, 4, 2)).reshape(bz, -1, N_EMBD)

    x = params['pos_emb'] + tok
    for p in params['blocks']:
        xn = _layernorm(x, p['ln1_g'], p['ln1_b'])
        q = xn @ p['wq'] + p['bq']
        k = xn @ p['wk'] + p['bk']
        v = xn @ p['wv'] + p['bv']
        sh = lambda t: t.reshape(bz, -1, N_HEAD, DIM_HEAD).transpose(0, 2, 1, 3)
        q, k, v = sh(q), sh(k), sh(v)
        att = jnp.einsum('bhnd,bhmd->bhnm', q, k) * SCALE
        att = jax.nn.softmax(att, axis=-1)
        y = jnp.einsum('bhnm,bhmd->bhnd', att, v)
        y = y.transpose(0, 2, 1, 3).reshape(bz, -1, N_EMBD)
        x = x + (y @ p['wp'] + p['bp'])
        xn = _layernorm(x, p['ln2_g'], p['ln2_b'])
        hdd = jnp.maximum(xn @ p['w1'] + p['b1'], 0.0)
        x = x + (hdd @ p['w2'] + p['b2'])
    x = _layernorm(x, params['lnf_g'], params['lnf_b'])

    x = x.reshape(bz, (N_VIEWS + 1) * SEQ_LEN, VERT, HORZ, N_EMBD)
    x = jnp.transpose(x, (0, 1, 4, 2, 3))
    img_out = x[:, :N_VIEWS * SEQ_LEN].reshape(bz * N_VIEWS * SEQ_LEN, N_EMBD, h, w)
    lid_out = x[:, N_VIEWS * SEQ_LEN:].reshape(bz * SEQ_LEN, N_EMBD, h, w)
    return img_out, lid_out


# ------------------------- deterministic parameters ---------------------------
def init_params(key):
    keys = jax.random.split(key, 3 + N_LAYER)
    params = {
        'pos_emb': 0.1 * jax.random.normal(keys[0], (1, T_TOKENS, N_EMBD), jnp.float32),
        'lnf_g': 1.0 + 0.1 * jax.random.normal(keys[1], (N_EMBD,), jnp.float32),
        'lnf_b': 0.1 * jax.random.normal(keys[2], (N_EMBD,), jnp.float32),
        'blocks': [],
    }
    for l in range(N_LAYER):
        ks = jax.random.split(keys[3 + l], 16)
        nrm = lambda k, s: jax.random.normal(k, s, jnp.float32)
        blk = {
            'ln1_g': 1.0 + 0.1 * nrm(ks[0], (N_EMBD,)),
            'ln1_b': 0.1 * nrm(ks[1], (N_EMBD,)),
            'wq': nrm(ks[2], (N_EMBD, N_EMBD)) / np.sqrt(N_EMBD),
            'bq': 0.1 * nrm(ks[3], (N_EMBD,)),
            'wk': nrm(ks[4], (N_EMBD, N_EMBD)) / np.sqrt(N_EMBD),
            'bk': 0.1 * nrm(ks[5], (N_EMBD,)),
            'wv': nrm(ks[6], (N_EMBD, N_EMBD)) / np.sqrt(N_EMBD),
            'bv': 0.1 * nrm(ks[7], (N_EMBD,)),
            'wp': nrm(ks[8], (N_EMBD, N_EMBD)) / np.sqrt(N_EMBD),
            'bp': 0.1 * nrm(ks[9], (N_EMBD,)),
            'ln2_g': 1.0 + 0.1 * nrm(ks[10], (N_EMBD,)),
            'ln2_b': 0.1 * nrm(ks[11], (N_EMBD,)),
            'w1': nrm(ks[12], (N_EMBD, MLP_DIM)) / np.sqrt(N_EMBD),
            'b1': 0.1 * nrm(ks[13], (MLP_DIM,)),
            'w2': nrm(ks[14], (MLP_DIM, N_EMBD)) / np.sqrt(MLP_DIM),
            'b2': 0.1 * nrm(ks[15], (N_EMBD,)),
        }
        params['blocks'].append(blk)
    return params


def pack_kernel_params(params):
    """Restructure per-layer weights for the kernel (layout plumbing, wrapper-side)."""
    def to_heads_w(w):   # (D, D) -> (H, D, dh): column block per head
        return w.reshape(N_EMBD, N_HEAD, DIM_HEAD).transpose(1, 0, 2)

    def to_heads_b(bv):  # (D,) -> (H, 1, dh)
        return bv.reshape(N_HEAD, DIM_HEAD)[:, None, :]

    blks = params['blocks']
    stack = lambda f: jnp.stack([f(p) for p in blks], axis=0)

    pos = params['pos_emb'][0]                                    # (T, D)
    ln1_g = stack(lambda p: p['ln1_g'][None, :])                  # (L, 1, D)
    ln1_b = stack(lambda p: p['ln1_b'][None, :])
    wqkv = stack(lambda p: jnp.concatenate(                       # (L, 3H, D, dh)
        [to_heads_w(p['wq']), to_heads_w(p['wk']), to_heads_w(p['wv'])], axis=0))
    bqkv = stack(lambda p: jnp.concatenate(                       # (L, 3H, 1, dh)
        [to_heads_b(p['bq']), to_heads_b(p['bk']), to_heads_b(p['bv'])], axis=0))
    wo = stack(lambda p: p['wp'].reshape(N_HEAD, DIM_HEAD, N_EMBD))  # (L, H, dh, D)
    bo = stack(lambda p: p['bp'][None, :])                        # (L, 1, D)
    ln2_g = stack(lambda p: p['ln2_g'][None, :])
    ln2_b = stack(lambda p: p['ln2_b'][None, :])
    w1 = stack(lambda p: p['w1'])                                 # (L, D, MLP)
    b1 = stack(lambda p: p['b1'][None, :])                        # (L, 1, MLP)
    w2 = stack(lambda p: p['w2'])                                 # (L, MLP, D)
    b2 = stack(lambda p: p['b2'][None, :])                        # (L, 1, D)
    lnf_g = params['lnf_g'][None, :]                              # (1, D)
    lnf_b = params['lnf_b'][None, :]
    return (pos, ln1_g, ln1_b, wqkv, bqkv, wo, bo,
            ln2_g, ln2_b, w1, b1, w2, b2, lnf_g, lnf_b)


if __name__ == "__main__":
    root = jax.random.PRNGKey(0)
    k_img, k_lid, k_p = jax.random.split(root, 3)
    image_tensor = jax.random.normal(
        k_img, (BZ * N_VIEWS * SEQ_LEN, N_EMBD, VERT, HORZ), jnp.float32)
    lidar_tensor = jax.random.normal(
        k_lid, (BZ * SEQ_LEN, N_EMBD, VERT, HORZ), jnp.float32)
    params = init_params(k_p)
    kparams = pack_kernel_params(params)

    img_out, lid_out = jax.block_until_ready(
        gpt_forward(image_tensor, lidar_tensor, kparams))

    img_ref, lid_ref = gpt_ref(image_tensor, lidar_tensor, params)
    # Tolerance covers the EUP approximate-reciprocal softmax normalization.
    np.testing.assert_allclose(np.asarray(img_out), np.asarray(img_ref), rtol=5e-3, atol=5e-3)
    np.testing.assert_allclose(np.asarray(lid_out), np.asarray(lid_ref), rtol=5e-3, atol=5e-3)

    print("KERNEL_OK")
</pallas_src>

<mosaic_0001>
module attributes {stable_mosaic.version = 11 : i64} {
  func.func @gpt_kernel(%arg0: i32, %arg1: memref<1x8x32xf32, #tpu.memory_space<vmem>>, %arg2: memref<8x32xf32, #tpu.memory_space<vmem>>, %arg3: memref<2x1x32xf32, #tpu.memory_space<vmem>>, %arg4: memref<2x1x32xf32, #tpu.memory_space<vmem>>, %arg5: memref<2x12x32x8xf32, #tpu.memory_space<vmem>>, %arg6: memref<2x12x1x8xf32, #tpu.memory_space<vmem>>, %arg7: memref<2x4x8x32xf32, #tpu.memory_space<vmem>>, %arg8: memref<2x1x32xf32, #tpu.memory_space<vmem>>, %arg9: memref<2x1x32xf32, #tpu.memory_space<vmem>>, %arg10: memref<2x1x32xf32, #tpu.memory_space<vmem>>, %arg11: memref<2x32x128xf32, #tpu.memory_space<vmem>>, %arg12: memref<2x1x128xf32, #tpu.memory_space<vmem>>, %arg13: memref<2x128x32xf32, #tpu.memory_space<vmem>>, %arg14: memref<2x1x32xf32, #tpu.memory_space<vmem>>, %arg15: memref<1x32xf32, #tpu.memory_space<vmem>>, %arg16: memref<1x32xf32, #tpu.memory_space<vmem>>, %arg17: memref<1x8x32xf32, #tpu.memory_space<vmem>>) attributes {dimension_semantics = [#tpu.dimension_semantics<parallel>], iteration_bounds = array<i64: 2>, scalar_prefetch = 0 : i64, scratch_operands = 0 : i64, tpu.core_type = #tpu.core_type<tc>, window_params = [{transform_indices = @transform_0, window_bounds = array<i64: 1, 8, 32>}, {pipeline_mode = #tpu.pipeline_mode<synchronous>, transform_indices = @transform_1, window_bounds = array<i64: 8, 32>}, {pipeline_mode = #tpu.pipeline_mode<synchronous>, transform_indices = @transform_2, window_bounds = array<i64: 2, 1, 32>}, {pipeline_mode = #tpu.pipeline_mode<synchronous>, transform_indices = @transform_3, window_bounds = array<i64: 2, 1, 32>}, {pipeline_mode = #tpu.pipeline_mode<synchronous>, transform_indices = @transform_4, window_bounds = array<i64: 2, 12, 32, 8>}, {pipeline_mode = #tpu.pipeline_mode<synchronous>, transform_indices = @transform_5, window_bounds = array<i64: 2, 12, 1, 8>}, {pipeline_mode = #tpu.pipeline_mode<synchronous>, transform_indices = @transform_6, window_bounds = array<i64: 2, 4, 8, 32>}, {pipeline_mode = #tpu.pipeline_mode<synchronous>, transform_indices = @transform_7, window_bounds = array<i64: 2, 1, 32>}, {pipeline_mode = #tpu.pipeline_mode<synchronous>, transform_indices = @transform_8, window_bounds = array<i64: 2, 1, 32>}, {pipeline_mode = #tpu.pipeline_mode<synchronous>, transform_indices = @transform_9, window_bounds = array<i64: 2, 1, 32>}, {pipeline_mode = #tpu.pipeline_mode<synchronous>, transform_indices = @transform_10, window_bounds = array<i64: 2, 32, 128>}, {pipeline_mode = #tpu.pipeline_mode<synchronous>, transform_indices = @transform_11, window_bounds = array<i64: 2, 1, 128>}, {pipeline_mode = #tpu.pipeline_mode<synchronous>, transform_indices = @transform_12, window_bounds = array<i64: 2, 128, 32>}, {pipeline_mode = #tpu.pipeline_mode<synchronous>, transform_indices = @transform_13, window_bounds = array<i64: 2, 1, 32>}, {pipeline_mode = #tpu.pipeline_mode<synchronous>, transform_indices = @transform_14, window_bounds = array<i64: 1, 32>}, {pipeline_mode = #tpu.pipeline_mode<synchronous>, transform_indices = @transform_15, window_bounds = array<i64: 1, 32>}, {transform_indices = @transform_16, window_bounds = array<i64: 1, 8, 32>}]} {
    %c0 = arith.constant 0 : index
    %c0_0 = arith.constant 0 : index
    %c0_1 = arith.constant 0 : index
    %0 = vector.load %arg1[%c0, %c0_0, %c0_1] : memref<1x8x32xf32, #tpu.memory_space<vmem>>, vector<1x8x32xf32>
    %1 = vector.shape_cast %0 : vector<1x8x32xf32> to vector<8x32xf32>
    %c0_2 = arith.constant 0 : index
    %c0_3 = arith.constant 0 : index
    %2 = vector.load %arg2[%c0_2, %c0_3] : memref<8x32xf32, #tpu.memory_space<vmem>>, vector<8x32xf32>
    %3 = arith.addf %1, %2 : vector<8x32xf32>
    %c0_4 = arith.constant 0 : index
    %c0_5 = arith.constant 0 : index
    %c0_6 = arith.constant 0 : index
    %4 = vector.load %arg3[%c0_4, %c0_5, %c0_6] : memref<2x1x32xf32, #tpu.memory_space<vmem>>, vector<1x1x32xf32>
    %5 = vector.shape_cast %4 : vector<1x1x32xf32> to vector<1x32xf32>
    %c0_7 = arith.constant 0 : index
    %c0_8 = arith.constant 0 : index
    %c0_9 = arith.constant 0 : index
    %6 = vector.load %arg4[%c0_7, %c0_8, %c0_9] : memref<2x1x32xf32, #tpu.memory_space<vmem>>, vector<1x1x32xf32>
    %7 = vector.shape_cast %6 : vector<1x1x32xf32> to vector<1x32xf32>
    %cst = arith.constant dense<0.000000e+00> : vector<8xf32>
    %8 = vector.multi_reduction <add>, %3, %cst [1] : vector<8x32xf32> to vector<8xf32>
    %9 = vector.shape_cast %8 : vector<8xf32> to vector<8x1xf32>
    %cst_10 = arith.constant 3.200000e+01 : f32
    %10 = vector.broadcast %cst_10 : f32 to vector<8x1xf32>
    %11 = arith.divf %9, %10 : vector<8x1xf32>
    %12 = vector.broadcast %11 : vector<8x1xf32> to vector<8x32xf32>
    %13 = arith.subf %3, %12 : vector<8x32xf32>
    %14 = arith.mulf %13, %13 : vector<8x32xf32>
    %cst_11 = arith.constant dense<0.000000e+00> : vector<8xf32>
    %15 = vector.multi_reduction <add>, %14, %cst_11 [1] : vector<8x32xf32> to vector<8xf32>
    %16 = vector.shape_cast %15 : vector<8xf32> to vector<8x1xf32>
    %cst_12 = arith.constant 3.200000e+01 : f32
    %17 = vector.broadcast %cst_12 : f32 to vector<8x1xf32>
    %18 = arith.divf %16, %17 : vector<8x1xf32>
    %19 = vector.broadcast %11 : vector<8x1xf32> to vector<8x32xf32>
    %20 = arith.subf %3, %19 : vector<8x32xf32>
    %cst_13 = arith.constant 9.99999974E-6 : f32
    %21 = vector.broadcast %cst_13 : f32 to vector<8x1xf32>
    %22 = arith.addf %18, %21 : vector<8x1xf32>
    %23 = math.rsqrt %22 : vector<8x1xf32>
    %24 = vector.broadcast %23 : vector<8x1xf32> to vector<8x32xf32>
    %25 = arith.mulf %20, %24 : vector<8x32xf32>
    %26 = vector.broadcast %5 : vector<1x32xf32> to vector<8x32xf32>
    %27 = arith.mulf %25, %26 : vector<8x32xf32>
    %28 = vector.broadcast %7 : vector<1x32xf32> to vector<8x32xf32>
    %29 = arith.addf %27, %28 : vector<8x32xf32>
    %30 = vector.shape_cast %29 : vector<8x32xf32> to vector<1x8x32xf32>
    %31 = vector.broadcast %30 : vector<1x8x32xf32> to vector<12x8x32xf32>
    %c0_14 = arith.constant 0 : index
    %c0_15 = arith.constant 0 : index
    %c0_16 = arith.constant 0 : index
    %c0_17 = arith.constant 0 : index
    %32 = vector.load %arg5[%c0_14, %c0_15, %c0_16, %c0_17] : memref<2x12x32x8xf32, #tpu.memory_space<vmem>>, vector<1x12x32x8xf32>
    %33 = vector.shape_cast %32 : vector<1x12x32x8xf32> to vector<12x32x8xf32>
    "tpu.trace_start"() <{level = 10 : i32, message = "gtd,gdf->gtf"}> : () -> ()
    %cst_18 = arith.constant dense<0.000000e+00> : vector<12x8x8xf32>
    %34 = tpu.matmul %31, %33, %cst_18 {dimension_numbers = #tpu.dot_dimension_numbers<[2], [1], [1], [2], [0, 0, 0, 1, 1, 2], [0], [0]>} : vector<12x8x32xf32>, vector<12x32x8xf32>, vector<12x8x8xf32> -> vector<12x8x8xf32>
    "tpu.trace_stop"() : () -> ()
    %c0_19 = arith.constant 0 : index
    %c0_20 = arith.constant 0 : index
    %c0_21 = arith.constant 0 : index
    %c0_22 = arith.constant 0 : index
    %35 = vector.load %arg6[%c0_19, %c0_20, %c0_21, %c0_22] : memref<2x12x1x8xf32, #tpu.memory_space<vmem>>, vector<1x12x1x8xf32>
    %36 = vector.shape_cast %35 : vector<1x12x1x8xf32> to vector<12x1x8xf32>
    %37 = vector.broadcast %36 : vector<12x1x8xf32> to vector<12x8x8xf32>
    %38 = arith.addf %34, %37 : vector<12x8x8xf32>
    %39 = vector.extract_strided_slice %38 {offsets = [0, 0, 0], sizes = [4, 8, 8], strides = [1, 1, 1]} : vector<12x8x8xf32> to vector<4x8x8xf32>
    %cst_23 = arith.constant 0.353553385 : f32
    %40 = vector.broadcast %cst_23 : f32 to vector<4x8x8xf32>
    %41 = arith.mulf %39, %40 : vector<4x8x8xf32>
    %42 = vector.extract_strided_slice %38 {offsets = [4, 0, 0], sizes = [4, 8, 8], strides = [1, 1, 1]} : vector<12x8x8xf32> to vector<4x8x8xf32>
    %43 = vector.extract_strided_slice %38 {offsets = [8, 0, 0], sizes = [4, 8, 8], strides = [1, 1, 1]} : vector<12x8x8xf32> to vector<4x8x8xf32>
    "tpu.trace_start"() <{level = 10 : i32, message = "hnd,hmd->hnm"}> : () -> ()
    %cst_24 = arith.constant dense<0.000000e+00> : vector<4x8x8xf32>
    %44 = tpu.matmul %41, %42, %cst_24 {dimension_numbers = #tpu.dot_dimension_numbers<[2], [2], [1], [1], [0, 0, 0, 1, 1, 1], [0], [0]>} : vector<4x8x8xf32>, vector<4x8x8xf32>, vector<4x8x8xf32> -> vector<4x8x8xf32>
    "tpu.trace_stop"() : () -> ()
    %cst_25 = arith.constant dense<0xFF800000> : vector<4x8xf32>
    %45 = vector.multi_reduction <maximumf>, %44, %cst_25 [2] : vector<4x8x8xf32> to vector<4x8xf32>
    %46 = vector.shape_cast %45 : vector<4x8xf32> to vector<4x8x1xf32>
    %47 = vector.broadcast %46 : vector<4x8x1xf32> to vector<4x8x8xf32>
    %48 = arith.subf %44, %47 : vector<4x8x8xf32>
    %49 = math.exp %48 : vector<4x8x8xf32>
    %cst_26 = arith.constant dense<0.000000e+00> : vector<4x8xf32>
    %50 = vector.multi_reduction <add>, %49, %cst_26 [2] : vector<4x8x8xf32> to vector<4x8xf32>
    %51 = vector.shape_cast %50 : vector<4x8xf32> to vector<4x8x1xf32>
    %52 = tpu.reciprocal %51 {approx = true} : vector<4x8x1xf32> -> vector<4x8x1xf32>
    %53 = vector.broadcast %52 : vector<4x8x1xf32> to vector<4x8x8xf32>
    %54 = arith.mulf %49, %53 : vector<4x8x8xf32>
    "tpu.trace_start"() <{level = 10 : i32, message = "hnm,hmd->hnd"}> : () -> ()
    %cst_27 = arith.constant dense<0.000000e+00> : vector<4x8x8xf32>
    %55 = tpu.matmul %54, %43, %cst_27 {dimension_numbers = #tpu.dot_dimension_numbers<[2], [1], [1], [2], [0, 0, 0, 1, 1, 2], [0], [0]>} : vector<4x8x8xf32>, vector<4x8x8xf32>, vector<4x8x8xf32> -> vector<4x8x8xf32>
    "tpu.trace_stop"() : () -> ()
    %c0_28 = arith.constant 0 : index
    %c0_29 = arith.constant 0 : index
    %c0_30 = arith.constant 0 : index
    %c0_31 = arith.constant 0 : index
    %56 = vector.load %arg7[%c0_28, %c0_29, %c0_30, %c0_31] : memref<2x4x8x32xf32, #tpu.memory_space<vmem>>, vector<1x4x8x32xf32>
    %57 = vector.shape_cast %56 : vector<1x4x8x32xf32> to vector<4x8x32xf32>
    "tpu.trace_start"() <{level = 10 : i32, message = "hnd,hde->hne"}> : () -> ()
    %cst_32 = arith.constant dense<0.000000e+00> : vector<4x8x32xf32>
    %58 = tpu.matmul %55, %57, %cst_32 {dimension_numbers = #tpu.dot_dimension_numbers<[2], [1], [1], [2], [0, 0, 0, 1, 1, 2], [0], [0]>} : vector<4x8x8xf32>, vector<4x8x32xf32>, vector<4x8x32xf32> -> vector<4x8x32xf32>
    "tpu.trace_stop"() : () -> ()
    %cst_33 = arith.constant dense<0.000000e+00> : vector<8x32xf32>
    %59 = vector.multi_reduction <add>, %58, %cst_33 [0] : vector<4x8x32xf32> to vector<8x32xf32>
    %60 = arith.addf %3, %59 : vector<8x32xf32>
    %c0_34 = arith.constant 0 : index
    %c0_35 = arith.constant 0 : index
    %c0_36 = arith.constant 0 : index
    %61 = vector.load %arg8[%c0_34, %c0_35, %c0_36] : memref<2x1x32xf32, #tpu.memory_space<vmem>>, vector<1x1x32xf32>
    %62 = vector.shape_cast %61 : vector<1x1x32xf32> to vector<1x32xf32>
    %63 = vector.broadcast %62 : vector<1x32xf32> to vector<8x32xf32>
    %64 = arith.addf %60, %63 : vector<8x32xf32>
    %c0_37 = arith.constant 0 : index
    %c0_38 = arith.constant 0 : index
    %c0_39 = arith.constant 0 : index
    %65 = vector.load %arg9[%c0_37, %c0_38, %c0_39] : memref<2x1x32xf32, #tpu.memory_space<vmem>>, vector<1x1x32xf32>
    %66 = vector.shape_cast %65 : vector<1x1x32xf32> to vector<1x32xf32>
    %c0_40 = arith.constant 0 : index
    %c0_41 = arith.constant 0 : index
    %c0_42 = arith.constant 0 : index
    %67 = vector.load %arg10[%c0_40, %c0_41, %c0_42] : memref<2x1x32xf32, #tpu.memory_space<vmem>>, vector<1x1x32xf32>
    %68 = vector.shape_cast %67 : vector<1x1x32xf32> to vector<1x32xf32>
    %cst_43 = arith.constant dense<0.000000e+00> : vector<8xf32>
    %69 = vector.multi_reduction <add>, %64, %cst_43 [1] : vector<8x32xf32> to vector<8xf32>
    %70 = vector.shape_cast %69 : vector<8xf32> to vector<8x1xf32>
    %cst_44 = arith.constant 3.200000e+01 : f32
    %71 = vector.broadcast %cst_44 : f32 to vector<8x1xf32>
    %72 = arith.divf %70, %71 : vector<8x1xf32>
    %73 = vector.broadcast %72 : vector<8x1xf32> to vector<8x32xf32>
    %74 = arith.subf %64, %73 : vector<8x32xf32>
    %75 = arith.mulf %74, %74 : vector<8x32xf32>
    %cst_45 = arith.constant dense<0.000000e+00> : vector<8xf32>
    %76 = vector.multi_reduction <add>, %75, %cst_45 [1] : vector<8x32xf32> to vector<8xf32>
    %77 = vector.shape_cast %76 : vector<8xf32> to vector<8x1xf32>
    %cst_46 = arith.constant 3.200000e+01 : f32
    %78 = vector.broadcast %cst_46 : f32 to vector<8x1xf32>
    %79 = arith.divf %77, %78 : vector<8x1xf32>
    %80 = vector.broadcast %72 : vector<8x1xf32> to vector<8x32xf32>
    %81 = arith.subf %64, %80 : vector<8x32xf32>
    %cst_47 = arith.constant 9.99999974E-6 : f32
    %82 = vector.broadcast %cst_47 : f32 to vector<8x1xf32>
    %83 = arith.addf %79, %82 : vector<8x1xf32>
    %84 = math.rsqrt %83 : vector<8x1xf32>
    %85 = vector.broadcast %84 : vector<8x1xf32> to vector<8x32xf32>
    %86 = arith.mulf %81, %85 : vector<8x32xf32>
    %87 = vector.broadcast %66 : vector<1x32xf32> to vector<8x32xf32>
    %88 = arith.mulf %86, %87 : vector<8x32xf32>
    %89 = vector.broadcast %68 : vector<1x32xf32> to vector<8x32xf32>
    %90 = arith.addf %88, %89 : vector<8x32xf32>
    %c0_48 = arith.constant 0 : index
    %c0_49 = arith.constant 0 : index
    %c0_50 = arith.constant 0 : index
    %91 = vector.load %arg11[%c0_48, %c0_49, %c0_50] : memref<2x32x128xf32, #tpu.memory_space<vmem>>, vector<1x32x128xf32>
    %92 = vector.shape_cast %91 : vector<1x32x128xf32> to vector<32x128xf32>
    %cst_51 = arith.constant dense<0.000000e+00> : vector<8x128xf32>
    %93 = tpu.matmul %90, %92, %cst_51 {dimension_numbers = #tpu.dot_dimension_numbers<[1], [0], [0], [1], [0, 0, 1, 1], [], []>} : vector<8x32xf32>, vector<32x128xf32>, vector<8x128xf32> -> vector<8x128xf32>
    %c0_52 = arith.constant 0 : index
    %c0_53 = arith.constant 0 : index
    %c0_54 = arith.constant 0 : index
    %94 = vector.load %arg12[%c0_52, %c0_53, %c0_54] : memref<2x1x128xf32, #tpu.memory_space<vmem>>, vector<1x1x128xf32>
    %95 = vector.shape_cast %94 : vector<1x1x128xf32> to vector<1x128xf32>
    %96 = vector.broadcast %95 : vector<1x128xf32> to vector<8x128xf32>
    %97 = arith.addf %93, %96 : vector<8x128xf32>
    %cst_55 = arith.constant 0.000000e+00 : f32
    %98 = vector.broadcast %cst_55 : f32 to vector<8x128xf32>
    %99 = arith.maximumf %97, %98 : vector<8x128xf32>
    %c0_56 = arith.constant 0 : index
    %c0_57 = arith.constant 0 : index
    %c0_58 = arith.constant 0 : index
    %100 = vector.load %arg13[%c0_56, %c0_57, %c0_58] : memref<2x128x32xf32, #tpu.memory_space<vmem>>, vector<1x128x32xf32>
    %101 = vector.shape_cast %100 : vector<1x128x32xf32> to vector<128x32xf32>
    %cst_59 = arith.constant dense<0.000000e+00> : vector<8x32xf32>
    %102 = tpu.matmul %99, %101, %cst_59 {dimension_numbers = #tpu.dot_dimension_numbers<[1], [0], [0], [1], [0, 0, 1, 1], [], []>} : vector<8x128xf32>, vector<128x32xf32>, vector<8x32xf32> -> vector<8x32xf32>
    %103 = arith.addf %64, %102 : vector<8x32xf32>
    %c0_60 = arith.constant 0 : index
    %c0_61 = arith.constant 0 : index
    %c0_62 = arith.constant 0 : index
    %104 = vector.load %arg14[%c0_60, %c0_61, %c0_62] : memref<2x1x32xf32, #tpu.memory_space<vmem>>, vector<1x1x32xf32>
    %105 = vector.shape_cast %104 : vector<1x1x32xf32> to vector<1x32xf32>
    %106 = vector.broadcast %105 : vector<1x32xf32> to vector<8x32xf32>
    %107 = arith.addf %103, %106 : vector<8x32xf32>
    %c1 = arith.constant 1 : index
    %c0_63 = arith.constant 0 : index
    %c0_64 = arith.constant 0 : index
    %108 = vector.load %arg3[%c1, %c0_63, %c0_64] : memref<2x1x32xf32, #tpu.memory_space<vmem>>, vector<1x1x32xf32>
    %109 = vector.shape_cast %108 : vector<1x1x32xf32> to vector<1x32xf32>
    %c1_65 = arith.constant 1 : index
    %c0_66 = arith.constant 0 : index
    %c0_67 = arith.constant 0 : index
    %110 = vector.load %arg4[%c1_65, %c0_66, %c0_67] : memref<2x1x32xf32, #tpu.memory_space<vmem>>, vector<1x1x32xf32>
    %111 = vector.shape_cast %110 : vector<1x1x32xf32> to vector<1x32xf32>
    %cst_68 = arith.constant dense<0.000000e+00> : vector<8xf32>
    %112 = vector.multi_reduction <add>, %107, %cst_68 [1] : vector<8x32xf32> to vector<8xf32>
    %113 = vector.shape_cast %112 : vector<8xf32> to vector<8x1xf32>
    %cst_69 = arith.constant 3.200000e+01 : f32
    %114 = vector.broadcast %cst_69 : f32 to vector<8x1xf32>
    %115 = arith.divf %113, %114 : vector<8x1xf32>
    %116 = vector.broadcast %115 : vector<8x1xf32> to vector<8x32xf32>
    %117 = arith.subf %107, %116 : vector<8x32xf32>
    %118 = arith.mulf %117, %117 : vector<8x32xf32>
    %cst_70 = arith.constant dense<0.000000e+00> : vector<8xf32>
    %119 = vector.multi_reduction <add>, %118, %cst_70 [1] : vector<8x32xf32> to vector<8xf32>
    %120 = vector.shape_cast %119 : vector<8xf32> to vector<8x1xf32>
    %cst_71 = arith.constant 3.200000e+01 : f32
    %121 = vector.broadcast %cst_71 : f32 to vector<8x1xf32>
    %122 = arith.divf %120, %121 : vector<8x1xf32>
    %123 = vector.broadcast %115 : vector<8x1xf32> to vector<8x32xf32>
    %124 = arith.subf %107, %123 : vector<8x32xf32>
    %cst_72 = arith.constant 9.99999974E-6 : f32
    %125 = vector.broadcast %cst_72 : f32 to vector<8x1xf32>
    %126 = arith.addf %122, %125 : vector<8x1xf32>
    %127 = math.rsqrt %126 : vector<8x1xf32>
    %128 = vector.broadcast %127 : vector<8x1xf32> to vector<8x32xf32>
    %129 = arith.mulf %124, %128 : vector<8x32xf32>
    %130 = vector.broadcast %109 : vector<1x32xf32> to vector<8x32xf32>
    %131 = arith.mulf %129, %130 : vector<8x32xf32>
    %132 = vector.broadcast %111 : vector<1x32xf32> to vector<8x32xf32>
    %133 = arith.addf %131, %132 : vector<8x32xf32>
    %134 = vector.shape_cast %133 : vector<8x32xf32> to vector<1x8x32xf32>
    %135 = vector.broadcast %134 : vector<1x8x32xf32> to vector<12x8x32xf32>
    %c1_73 = arith.constant 1 : index
    %c0_74 = arith.constant 0 : index
    %c0_75 = arith.constant 0 : index
    %c0_76 = arith.constant 0 : index
    %136 = vector.load %arg5[%c1_73, %c0_74, %c0_75, %c0_76] : memref<2x12x32x8xf32, #tpu.memory_space<vmem>>, vector<1x12x32x8xf32>
    %137 = vector.shape_cast %136 : vector<1x12x32x8xf32> to vector<12x32x8xf32>
    "tpu.trace_start"() <{level = 10 : i32, message = "gtd,gdf->gtf"}> : () -> ()
    %cst_77 = arith.constant dense<0.000000e+00> : vector<12x8x8xf32>
    %138 = tpu.matmul %135, %137, %cst_77 {dimension_numbers = #tpu.dot_dimension_numbers<[2], [1], [1], [2], [0, 0, 0, 1, 1, 2], [0], [0]>} : vector<12x8x32xf32>, vector<12x32x8xf32>, vector<12x8x8xf32> -> vector<12x8x8xf32>
    "tpu.trace_stop"() : () -> ()
    %c1_78 = arith.constant 1 : index
    %c0_79 = arith.constant 0 : index
    %c0_80 = arith.constant 0 : index
    %c0_81 = arith.constant 0 : index
    %139 = vector.load %arg6[%c1_78, %c0_79, %c0_80, %c0_81] : memref<2x12x1x8xf32, #tpu.memory_space<vmem>>, vector<1x12x1x8xf32>
    %140 = vector.shape_cast %139 : vector<1x12x1x8xf32> to vector<12x1x8xf32>
    %141 = vector.broadcast %140 : vector<12x1x8xf32> to vector<12x8x8xf32>
    %142 = arith.addf %138, %141 : vector<12x8x8xf32>
    %143 = vector.extract_strided_slice %142 {offsets = [0, 0, 0], sizes = [4, 8, 8], strides = [1, 1, 1]} : vector<12x8x8xf32> to vector<4x8x8xf32>
    %cst_82 = arith.constant 0.353553385 : f32
    %144 = vector.broadcast %cst_82 : f32 to vector<4x8x8xf32>
    %145 = arith.mulf %143, %144 : vector<4x8x8xf32>
    %146 = vector.extract_strided_slice %142 {offsets = [4, 0, 0], sizes = [4, 8, 8], strides = [1, 1, 1]} : vector<12x8x8xf32> to vector<4x8x8xf32>
    %147 = vector.extract_strided_slice %142 {offsets = [8, 0, 0], sizes = [4, 8, 8], strides = [1, 1, 1]} : vector<12x8x8xf32> to vector<4x8x8xf32>
    "tpu.trace_start"() <{level = 10 : i32, message = "hnd,hmd->hnm"}> : () -> ()
    %cst_83 = arith.constant dense<0.000000e+00> : vector<4x8x8xf32>
    %148 = tpu.matmul %145, %146, %cst_83 {dimension_numbers = #tpu.dot_dimension_numbers<[2], [2], [1], [1], [0, 0, 0, 1, 1, 1], [0], [0]>} : vector<4x8x8xf32>, vector<4x8x8xf32>, vector<4x8x8xf32> -> vector<4x8x8xf32>
    "tpu.trace_stop"() : () -> ()
    %cst_84 = arith.constant dense<0xFF800000> : vector<4x8xf32>
    %149 = vector.multi_reduction <maximumf>, %148, %cst_84 [2] : vector<4x8x8xf32> to vector<4x8xf32>
    %150 = vector.shape_cast %149 : vector<4x8xf32> to vector<4x8x1xf32>
    %151 = vector.broadcast %150 : vector<4x8x1xf32> to vector<4x8x8xf32>
    %152 = arith.subf %148, %151 : vector<4x8x8xf32>
    %153 = math.exp %152 : vector<4x8x8xf32>
    %cst_85 = arith.constant dense<0.000000e+00> : vector<4x8xf32>
    %154 = vector.multi_reduction <add>, %153, %cst_85 [2] : vector<4x8x8xf32> to vector<4x8xf32>
    %155 = vector.shape_cast %154 : vector<4x8xf32> to vector<4x8x1xf32>
    %156 = tpu.reciprocal %155 {approx = true} : vector<4x8x1xf32> -> vector<4x8x1xf32>
    %157 = vector.broadcast %156 : vector<4x8x1xf32> to vector<4x8x8xf32>
    %158 = arith.mulf %153, %157 : vector<4x8x8xf32>
    "tpu.trace_start"() <{level = 10 : i32, message = "hnm,hmd->hnd"}> : () -> ()
    %cst_86 = arith.constant dense<0.000000e+00> : vector<4x8x8xf32>
    %159 = tpu.matmul %158, %147, %cst_86 {dimension_numbers = #tpu.dot_dimension_numbers<[2], [1], [1], [2], [0, 0, 0, 1, 1, 2], [0], [0]>} : vector<4x8x8xf32>, vector<4x8x8xf32>, vector<4x8x8xf32> -> vector<4x8x8xf32>
    "tpu.trace_stop"() : () -> ()
    %c1_87 = arith.constant 1 : index
    %c0_88 = arith.constant 0 : index
    %c0_89 = arith.constant 0 : index
    %c0_90 = arith.constant 0 : index
    %160 = vector.load %arg7[%c1_87, %c0_88, %c0_89, %c0_90] : memref<2x4x8x32xf32, #tpu.memory_space<vmem>>, vector<1x4x8x32xf32>
    %161 = vector.shape_cast %160 : vector<1x4x8x32xf32> to vector<4x8x32xf32>
    "tpu.trace_start"() <{level = 10 : i32, message = "hnd,hde->hne"}> : () -> ()
    %cst_91 = arith.constant dense<0.000000e+00> : vector<4x8x32xf32>
    %162 = tpu.matmul %159, %161, %cst_91 {dimension_numbers = #tpu.dot_dimension_numbers<[2], [1], [1], [2], [0, 0, 0, 1, 1, 2], [0], [0]>} : vector<4x8x8xf32>, vector<4x8x32xf32>, vector<4x8x32xf32> -> vector<4x8x32xf32>
    "tpu.trace_stop"() : () -> ()
    %cst_92 = arith.constant dense<0.000000e+00> : vector<8x32xf32>
    %163 = vector.multi_reduction <add>, %162, %cst_92 [0] : vector<4x8x32xf32> to vector<8x32xf32>
    %164 = arith.addf %107, %163 : vector<8x32xf32>
    %c1_93 = arith.constant 1 : index
    %c0_94 = arith.constant 0 : index
    %c0_95 = arith.constant 0 : index
    %165 = vector.load %arg8[%c1_93, %c0_94, %c0_95] : memref<2x1x32xf32, #tpu.memory_space<vmem>>, vector<1x1x32xf32>
    %166 = vector.shape_cast %165 : vector<1x1x32xf32> to vector<1x32xf32>
    %167 = vector.broadcast %166 : vector<1x32xf32> to vector<8x32xf32>
    %168 = arith.addf %164, %167 : vector<8x32xf32>
    %c1_96 = arith.constant 1 : index
    %c0_97 = arith.constant 0 : index
    %c0_98 = arith.constant 0 : index
    %169 = vector.load %arg9[%c1_96, %c0_97, %c0_98] : memref<2x1x32xf32, #tpu.memory_space<vmem>>, vector<1x1x32xf32>
    %170 = vector.shape_cast %169 : vector<1x1x32xf32> to vector<1x32xf32>
    %c1_99 = arith.constant 1 : index
    %c0_100 = arith.constant 0 : index
    %c0_101 = arith.constant 0 : index
    %171 = vector.load %arg10[%c1_99, %c0_100, %c0_101] : memref<2x1x32xf32, #tpu.memory_space<vmem>>, vector<1x1x32xf32>
    %172 = vector.shape_cast %171 : vector<1x1x32xf32> to vector<1x32xf32>
    %cst_102 = arith.constant dense<0.000000e+00> : vector<8xf32>
    %173 = vector.multi_reduction <add>, %168, %cst_102 [1] : vector<8x32xf32> to vector<8xf32>
    %174 = vector.shape_cast %173 : vector<8xf32> to vector<8x1xf32>
    %cst_103 = arith.constant 3.200000e+01 : f32
    %175 = vector.broadcast %cst_103 : f32 to vector<8x1xf32>
    %176 = arith.divf %174, %175 : vector<8x1xf32>
    %177 = vector.broadcast %176 : vector<8x1xf32> to vector<8x32xf32>
    %178 = arith.subf %168, %177 : vector<8x32xf32>
    %179 = arith.mulf %178, %178 : vector<8x32xf32>
    %cst_104 = arith.constant dense<0.000000e+00> : vector<8xf32>
    %180 = vector.multi_reduction <add>, %179, %cst_104 [1] : vector<8x32xf32> to vector<8xf32>
    %181 = vector.shape_cast %180 : vector<8xf32> to vector<8x1xf32>
    %cst_105 = arith.constant 3.200000e+01 : f32
    %182 = vector.broadcast %cst_105 : f32 to vector<8x1xf32>
    %183 = arith.divf %181, %182 : vector<8x1xf32>
    %184 = vector.broadcast %176 : vector<8x1xf32> to vector<8x32xf32>
    %185 = arith.subf %168, %184 : vector<8x32xf32>
    %cst_106 = arith.constant 9.99999974E-6 : f32
    %186 = vector.broadcast %cst_106 : f32 to vector<8x1xf32>
    %187 = arith.addf %183, %186 : vector<8x1xf32>
    %188 = math.rsqrt %187 : vector<8x1xf32>
    %189 = vector.broadcast %188 : vector<8x1xf32> to vector<8x32xf32>
    %190 = arith.mulf %185, %189 : vector<8x32xf32>
    %191 = vector.broadcast %170 : vector<1x32xf32> to vector<8x32xf32>
    %192 = arith.mulf %190, %191 : vector<8x32xf32>
    %193 = vector.broadcast %172 : vector<1x32xf32> to vector<8x32xf32>
    %194 = arith.addf %192, %193 : vector<8x32xf32>
    %c1_107 = arith.constant 1 : index
    %c0_108 = arith.constant 0 : index
    %c0_109 = arith.constant 0 : index
    %195 = vector.load %arg11[%c1_107, %c0_108, %c0_109] : memref<2x32x128xf32, #tpu.memory_space<vmem>>, vector<1x32x128xf32>
    %196 = vector.shape_cast %195 : vector<1x32x128xf32> to vector<32x128xf32>
    %cst_110 = arith.constant dense<0.000000e+00> : vector<8x128xf32>
    %197 = tpu.matmul %194, %196, %cst_110 {dimension_numbers = #tpu.dot_dimension_numbers<[1], [0], [0], [1], [0, 0, 1, 1], [], []>} : vector<8x32xf32>, vector<32x128xf32>, vector<8x128xf32> -> vector<8x128xf32>
    %c1_111 = arith.constant 1 : index
    %c0_112 = arith.constant 0 : index
    %c0_113 = arith.constant 0 : index
    %198 = vector.load %arg12[%c1_111, %c0_112, %c0_113] : memref<2x1x128xf32, #tpu.memory_space<vmem>>, vector<1x1x128xf32>
    %199 = vector.shape_cast %198 : vector<1x1x128xf32> to vector<1x128xf32>
    %200 = vector.broadcast %199 : vector<1x128xf32> to vector<8x128xf32>
    %201 = arith.addf %197, %200 : vector<8x128xf32>
    %cst_114 = arith.constant 0.000000e+00 : f32
    %202 = vector.broadcast %cst_114 : f32 to vector<8x128xf32>
    %203 = arith.maximumf %201, %202 : vector<8x128xf32>
    %c1_115 = arith.constant 1 : index
    %c0_116 = arith.constant 0 : index
    %c0_117 = arith.constant 0 : index
    %204 = vector.load %arg13[%c1_115, %c0_116, %c0_117] : memref<2x128x32xf32, #tpu.memory_space<vmem>>, vector<1x128x32xf32>
    %205 = vector.shape_cast %204 : vector<1x128x32xf32> to vector<128x32xf32>
    %cst_118 = arith.constant dense<0.000000e+00> : vector<8x32xf32>
    %206 = tpu.matmul %203, %205, %cst_118 {dimension_numbers = #tpu.dot_dimension_numbers<[1], [0], [0], [1], [0, 0, 1, 1], [], []>} : vector<8x128xf32>, vector<128x32xf32>, vector<8x32xf32> -> vector<8x32xf32>
    %207 = arith.addf %168, %206 : vector<8x32xf32>
    %c1_119 = arith.constant 1 : index
    %c0_120 = arith.constant 0 : index
    %c0_121 = arith.constant 0 : index
    %208 = vector.load %arg14[%c1_119, %c0_120, %c0_121] : memref<2x1x32xf32, #tpu.memory_space<vmem>>, vector<1x1x32xf32>
    %209 = vector.shape_cast %208 : vector<1x1x32xf32> to vector<1x32xf32>
    %210 = vector.broadcast %209 : vector<1x32xf32> to vector<8x32xf32>
    %211 = arith.addf %207, %210 : vector<8x32xf32>
    %c0_122 = arith.constant 0 : index
    %c0_123 = arith.constant 0 : index
    %212 = vector.load %arg15[%c0_122, %c0_123] : memref<1x32xf32, #tpu.memory_space<vmem>>, vector<1x32xf32>
    %c0_124 = arith.constant 0 : index
    %c0_125 = arith.constant 0 : index
    %213 = vector.load %arg16[%c0_124, %c0_125] : memref<1x32xf32, #tpu.memory_space<vmem>>, vector<1x32xf32>
    %cst_126 = arith.constant dense<0.000000e+00> : vector<8xf32>
    %214 = vector.multi_reduction <add>, %211, %cst_126 [1] : vector<8x32xf32> to vector<8xf32>
    %215 = vector.shape_cast %214 : vector<8xf32> to vector<8x1xf32>
    %cst_127 = arith.constant 3.200000e+01 : f32
    %216 = vector.broadcast %cst_127 : f32 to vector<8x1xf32>
    %217 = arith.divf %215, %216 : vector<8x1xf32>
    %218 = vector.broadcast %217 : vector<8x1xf32> to vector<8x32xf32>
    %219 = arith.subf %211, %218 : vector<8x32xf32>
    %220 = arith.mulf %219, %219 : vector<8x32xf32>
    %cst_128 = arith.constant dense<0.000000e+00> : vector<8xf32>
    %221 = vector.multi_reduction <add>, %220, %cst_128 [1] : vector<8x32xf32> to vector<8xf32>
    %222 = vector.shape_cast %221 : vector<8xf32> to vector<8x1xf32>
    %cst_129 = arith.constant 3.200000e+01 : f32
    %223 = vector.broadcast %cst_129 : f32 to vector<8x1xf32>
    %224 = arith.divf %222, %223 : vector<8x1xf32>
    %225 = vector.broadcast %217 : vector<8x1xf32> to vector<8x32xf32>
    %226 = arith.subf %211, %225 : vector<8x32xf32>
    %cst_130 = arith.constant 9.99999974E-6 : f32
    %227 = vector.broadcast %cst_130 : f32 to vector<8x1xf32>
    %228 = arith.addf %224, %227 : vector<8x1xf32>
    %229 = math.rsqrt %228 : vector<8x1xf32>
    %230 = vector.broadcast %229 : vector<8x1xf32> to vector<8x32xf32>
    %231 = arith.mulf %226, %230 : vector<8x32xf32>
    %232 = vector.broadcast %212 : vector<1x32xf32> to vector<8x32xf32>
    %233 = arith.mulf %231, %232 : vector<8x32xf32>
    %234 = vector.broadcast %213 : vector<1x32xf32> to vector<8x32xf32>
    %235 = arith.addf %233, %234 : vector<8x32xf32>
    %c0_131 = arith.constant 0 : index
    %c0_132 = arith.constant 0 : index
    %c0_133 = arith.constant 0 : index
    %236 = vector.load %arg17[%c0_131, %c0_132, %c0_133] : memref<1x8x32xf32, #tpu.memory_space<vmem>>, vector<1x8x32xf32>
    %237 = vector.shape_cast %236 : vector<1x8x32xf32> to vector<8x32xf32>
    %238 = vector.shape_cast %235 : vector<8x32xf32> to vector<1x8x32xf32>
    tpu.vector_store %arg17[%c0_131, %c0_132, %c0_133], %238 {strides = array<i32>} : memref<1x8x32xf32, #tpu.memory_space<vmem>>, vector<1x8x32xf32>,
    return
  }
  func.func @transform_0(%arg0: i32) -> (i32, i32, i32) {
    %c0_i32 = arith.constant 0 : i32
    %c0_i32_0 = arith.constant 0 : i32
    %c0_i32_1 = arith.constant 0 : i32
    return %arg0, %c0_i32, %c0_i32_0 : i32, i32, i32
  }
  func.func @transform_1(%arg0: i32) -> (i32, i32) {
    %c0_i32 = arith.constant 0 : i32
    %c0_i32_0 = arith.constant 0 : i32
    %c0_i32_1 = arith.constant 0 : i32
    return %c0_i32, %c0_i32_0 : i32, i32
  }
  func.func @transform_2(%arg0: i32) -> (i32, i32, i32) {
    %c0_i32 = arith.constant 0 : i32
    %c0_i32_0 = arith.constant 0 : i32
    %c0_i32_1 = arith.constant 0 : i32
    %c0_i32_2 = arith.constant 0 : i32
    return %c0_i32, %c0_i32_0, %c0_i32_1 : i32, i32, i32
  }
  func.func @transform_3(%arg0: i32) -> (i32, i32, i32) {
    %c0_i32 = arith.constant 0 : i32
    %c0_i32_0 = arith.constant 0 : i32
    %c0_i32_1 = arith.constant 0 : i32
    %c0_i32_2 = arith.constant 0 : i32
    return %c0_i32, %c0_i32_0, %c0_i32_1 : i32, i32, i32
  }
  func.func @transform_4(%arg0: i32) -> (i32, i32, i32, i32) {
    %c0_i32 = arith.constant 0 : i32
    %c0_i32_0 = arith.constant 0 : i32
    %c0_i32_1 = arith.constant 0 : i32
    %c0_i32_2 = arith.constant 0 : i32
    %c0_i32_3 = arith.constant 0 : i32
    return %c0_i32, %c0_i32_0, %c0_i32_1, %c0_i32_2 : i32, i32, i32, i32
  }
  func.func @transform_5(%arg0: i32) -> (i32, i32, i32, i32) {
    %c0_i32 = arith.constant 0 : i32
    %c0_i32_0 = arith.constant 0 : i32
    %c0_i32_1 = arith.constant 0 : i32
    %c0_i32_2 = arith.constant 0 : i32
    %c0_i32_3 = arith.constant 0 : i32
    return %c0_i32, %c0_i32_0, %c0_i32_1, %c0_i32_2 : i32, i32, i32, i32
  }
  func.func @transform_6(%arg0: i32) -> (i32, i32, i32, i32) {
    %c0_i32 = arith.constant 0 : i32
    %c0_i32_0 = arith.constant 0 : i32
    %c0_i32_1 = arith.constant 0 : i32
    %c0_i32_2 = arith.constant 0 : i32
    %c0_i32_3 = arith.constant 0 : i32
    return %c0_i32, %c0_i32_0, %c0_i32_1, %c0_i32_2 : i32, i32, i32, i32
  }
  func.func @transform_7(%arg0: i32) -> (i32, i32, i32) {
    %c0_i32 = arith.constant 0 : i32
    %c0_i32_0 = arith.constant 0 : i32
    %c0_i32_1 = arith.constant 0 : i32
    %c0_i32_2 = arith.constant 0 : i32
    return %c0_i32, %c0_i32_0, %c0_i32_1 : i32, i32, i32
  }
  func.func @transform_8(%arg0: i32) -> (i32, i32, i32) {
    %c0_i32 = arith.constant 0 : i32
    %c0_i32_0 = arith.constant 0 : i32
    %c0_i32_1 = arith.constant 0 : i32
    %c0_i32_2 = arith.constant 0 : i32
    return %c0_i32, %c0_i32_0, %c0_i32_1 : i32, i32, i32
  }
  func.func @transform_9(%arg0: i32) -> (i32, i32, i32) {
    %c0_i32 = arith.constant 0 : i32
    %c0_i32_0 = arith.constant 0 : i32
    %c0_i32_1 = arith.constant 0 : i32
    %c0_i32_2 = arith.constant 0 : i32
    return %c0_i32, %c0_i32_0, %c0_i32_1 : i32, i32, i32
  }
  func.func @transform_10(%arg0: i32) -> (i32, i32, i32) {
    %c0_i32 = arith.constant 0 : i32
    %c0_i32_0 = arith.constant 0 : i32
    %c0_i32_1 = arith.constant 0 : i32
    %c0_i32_2 = arith.constant 0 : i32
    return %c0_i32, %c0_i32_0, %c0_i32_1 : i32, i32, i32
  }
  func.func @transform_11(%arg0: i32) -> (i32, i32, i32) {
    %c0_i32 = arith.constant 0 : i32
    %c0_i32_0 = arith.constant 0 : i32
    %c0_i32_1 = arith.constant 0 : i32
    %c0_i32_2 = arith.constant 0 : i32
    return %c0_i32, %c0_i32_0, %c0_i32_1 : i32, i32, i32
  }
  func.func @transform_12(%arg0: i32) -> (i32, i32, i32) {
    %c0_i32 = arith.constant 0 : i32
    %c0_i32_0 = arith.constant 0 : i32
    %c0_i32_1 = arith.constant 0 : i32
    %c0_i32_2 = arith.constant 0 : i32
    return %c0_i32, %c0_i32_0, %c0_i32_1 : i32, i32, i32
  }
  func.func @transform_13(%arg0: i32) -> (i32, i32, i32) {
    %c0_i32 = arith.constant 0 : i32
    %c0_i32_0 = arith.constant 0 : i32
    %c0_i32_1 = arith.constant 0 : i32
    %c0_i32_2 = arith.constant 0 : i32
    return %c0_i32, %c0_i32_0, %c0_i32_1 : i32, i32, i32
  }
  func.func @transform_14(%arg0: i32) -> (i32, i32) {
    %c0_i32 = arith.constant 0 : i32
    %c0_i32_0 = arith.constant 0 : i32
    %c0_i32_1 = arith.constant 0 : i32
    return %c0_i32, %c0_i32_0 : i32, i32
  }
  func.func @transform_15(%arg0: i32) -> (i32, i32) {
    %c0_i32 = arith.constant 0 : i32
    %c0_i32_0 = arith.constant 0 : i32
    %c0_i32_1 = arith.constant 0 : i32
    return %c0_i32, %c0_i32_0 : i32, i32
  }
  func.func @transform_16(%arg0: i32) -> (i32, i32, i32) {
    %c0_i32 = arith.constant 0 : i32
    %c0_i32_0 = arith.constant 0 : i32
    %c0_i32_1 = arith.constant 0 : i32
    return %arg0, %c0_i32, %c0_i32_0 : i32, i32, i32
  }
}

</mosaic_0001>

<bundles_post_ra>
// kernel: gpt_forward.1
= control target key start
LH: loop header
LB: loop body
LE: loop exit
PB: predicated region body
PF: predicated region fallthrough
CT: control target
= control target key end

     0   :  { %s5989_s21 = smov 0   ;;  %s6982_s0 = inlined_call_operand.vmem [shape: f32[2,8,32], index: 0, kind: input, shape index: {}]   ;;  %s6983_s1 = inlined_call_operand.vmem [shape: f32[8,32], index: 1, kind: input, shape index: {}]   ;;  %s6984_s2 = inlined_call_operand.vmem [shape: f32[2,1,32], index: 2, kind: input, shape index: {}]   ;;  %s6985_s3 = inlined_call_operand.vmem [shape: f32[2,1,32], index: 3, kind: input, shape index: {}]   ;;  %s6986_s4 = inlined_call_operand.vmem [shape: f32[2,12,32,8], index: 4, kind: input, shape index: {}]   ;;  %s6987_s5 = inlined_call_operand.vmem [shape: f32[2,12,1,8], index: 5, kind: input, shape index: {}]   ;;  %s6988_s6 = inlined_call_operand.vmem [shape: f32[2,4,8,32], index: 6, kind: input, shape index: {}]   ;;  %s6989_s7 = inlined_call_operand.vmem [shape: f32[2,1,32], index: 7, kind: input, shape index: {}]   ;;  %s6990_s8 = inlined_call_operand.vmem [shape: f32[2,1,32], index: 8, kind: input, shape index: {}]   ;;  %s6991_s9 = inlined_call_operand.vmem [shape: f32[2,1,32], index: 9, kind: input, shape index: {}]   ;;  %s6992_s10 = inlined_call_operand.vmem [shape: f32[2,32,128], index: 10, kind: input, shape index: {}]   ;;  %s6993_s11 = inlined_call_operand.vmem [shape: f32[2,1,128], index: 11, kind: input, shape index: {}]   ;;  %s6994_s12 = inlined_call_operand.vmem [shape: f32[2,128,32], index: 12, kind: input, shape index: {}]   ;;  %s6995_s13 = inlined_call_operand.vmem [shape: f32[2,1,32], index: 13, kind: input, shape index: {}]   ;;  %s6996_s14 = inlined_call_operand.vmem [shape: f32[1,32], index: 14, kind: input, shape index: {}]   ;;  %s6997_s15 = inlined_call_operand.vmem [shape: f32[1,32], index: 15, kind: input, shape index: {}]   ;;  %s6998_s16 = inlined_call_operand.vmem [shape: f32[2,8,32], index: 16, kind: output, shape index: {}]  }
   0x1   :  { %6999 = sst [smem:[#allocation2_spill]] %s6982_s0 }
   0x2 LB: > { %s4956_s22 = sadd.s32 4294967295, %s5900_s21   ;;  %p4960_p0 = scmp.ge.s32.totalorder %s5900_s21, 1  ;;  %s5900_s21 = sphi %s5989_s21, %s26_s21  }
   0x3   : > { %p461_p1 = scmp.lt.s32.totalorder %s5900_s21, 3 }
   0x5   : > { %p462_p2 = pnand %p4960_p0, %p461_p1 }
   0x6   : > { %p509_p3 = scmp.lt.s32.totalorder (!%p462_p2), %s4956_s22, 1  ;;  %s7000_s28 = sld [smem:[#allocation2_spill]] (!%p462_p2) }
   0x7   : > { %465 = sbr.rel (%p462_p2) target bundleno = 4625 (0x1211), region = 84 }
   0xc   : > { %s7002_s22 = smov (!%p509_p3, %s4956_s22), 1  ;;  %v518_v0 = vld [vmem:[%s6983_s1] sm:$0xff]  ;;  %vm522_vm0 = vcmask 261120   ;;  %v5902_v9 = vmov 0.0   ;;  %v554_v10 = vld [vmem:[%s6986_s4 + $0x18] sm:$0xff]  ;;  %v553_v12 = vld [vmem:[%s6986_s4 + $0x10] sm:$0xff] }
   0xd   : > { %s4961_s23 = sshll.u32 %s7002_s22, 3  ;;  %5366 = vmatprep.subr.mxu0 %v5902_v9  ;;  %5399 = vmatprep.subr.mxu1 %v5902_v9  ;;  %v566_v11 = vld [vmem:[%s6986_s4 + $0x78] sm:$0xff]  ;;  %v565_v13 = vld [vmem:[%s6986_s4 + $0x70] sm:$0xff]  ;;  %v552_v14 = vld [vmem:[%s6986_s4 + $0x8] sm:$0xff]  ;;  %vm5903_vm1 = vmmov 0   ;;  %vm1530_vm2 = vcmask 64512  }
   0xe   : > { %s512_s29 = scalar_lea.vmem %s7000_s28, %s4961_s23  ;;  %5367 = vmatpush3.msra.mxu0 %v554_v10  ;;  %5400 = vmatpush3.msra.mxu1 %v566_v11  ;;  %v564_v15 = vld [vmem:[%s6986_s4 + $0x68] sm:$0xff]  ;;  %v551_v16 = vld [vmem:[%s6986_s4] sm:$0xff]  ;;  %v558_v27 = vld [vmem:[%s6986_s4 + $0x38] sm:$0xff]  ;;  %s516_s28 = scalar_lea.vmem %s6998_s16, %s4961_s23 }
   0xf   : > { %v517_v1 = vld [vmem:[%s512_s29] sm:$0xff]  ;;  %5368 = vmatprep.subr.mxu0 %v5902_v9  ;;  %5401 = vmatprep.subr.mxu1 %v5902_v9  ;;  %v574_v28 = vld [vmem:[%s6986_s4 + $0xb8] sm:$0xff]  ;;  %v557_v29 = vld [vmem:[%s6986_s4 + $0x30] sm:$0xff] }
  0x10   : > { %v6008_v2 = vadd.f32 %v518_v0, %v517_v1  ;;  %5369 = vmatpush3.msra.mxu0 %v553_v12  ;;  %5402 = vmatpush3.msra.mxu1 %v565_v13  ;;  %v563_v17 = vld [vmem:[%s6986_s4 + $0x60] sm:$0xff]  ;;  %v573_v30 = vld [vmem:[%s6986_s4 + $0xb0] sm:$0xff]  ;;  %v556_v31 = vld [vmem:[%s6986_s4 + $0x28] sm:$0xff] }
  0x11   : > { %5370 = vmatprep.subr.mxu0 %v5902_v9  ;;  %5403 = vmatprep.subr.mxu1 %v5902_v9  ;;  %v4963_v22 = vld [vmem:[%s6984_s2] ss:$0 sm:$0xff]  ;;  %v572_v32 = vld [vmem:[%s6986_s4 + $0xa8] sm:$0xff]  ;;  %v562_v35 = vld [vmem:[%s6986_s4 + $0x58] sm:$0xff] }
  0x12   : > { %v523_v3 = vsel %vm522_vm0, %v6008_v2, 0.0  ;;  %5371 = vmatpush3.msra.mxu0 %v552_v14  ;;  %5404 = vmatpush3.msra.mxu1 %v564_v15  ;;  %v4964_v24 = vld [vmem:[%s6985_s3] ss:$0 sm:$0xff]  ;;  %v582_v36 = vld [vmem:[%s6986_s4 + $0xf8] sm:$0xff]  ;;  %v561_v37 = vld [vmem:[%s6986_s4 + $0x50] sm:$0xff] }
  0x13   : > { %524 = vadd.xlane.f32.xlu0 %v523_v3  ;;  %5372 = vmatprep.subr.mxu0 %v5902_v9  ;;  %v555_v33 = vld [vmem:[%s6986_s4 + $0x20] sm:$0xff]  ;;  %v581_v38 = vld [vmem:[%s6986_s4 + $0xf0] sm:$0xff]  ;;  %v560_v39 = vld [vmem:[%s6986_s4 + $0x48] sm:$0xff] }
  0x14   : > { %5405 = vmatprep.subr.mxu1 %v5902_v9  ;;  %5373 = vmatpush3.msra.mxu0 %v551_v16  ;;  %v571_v34 = vld [vmem:[%s6986_s4 + $0xa0] sm:$0xff]  ;;  %v580_v40 = vld [vmem:[%s6986_s4 + $0xe8] sm:$0xff]  ;;  %v570_v43 = vld [vmem:[%s6986_s4 + $0x98] sm:$0xff] }
  0x15   : > { %5406 = vmatpush3.msra.mxu1 %v563_v17  ;;  %5374 = vmatprep.mubr.msk.f32.mxu0 %vm5903_vm1, %v5902_v9  ;;  %v559_v41 = vld [vmem:[%s6986_s4 + $0x40] sm:$0xff]  ;;  %v590_v44 = vld [vmem:[%s6986_s4 + $0x138] sm:$0xff]  ;;  %v569_v45 = vld [vmem:[%s6986_s4 + $0x90] sm:$0xff] }
  0x16   : > { %5377 = vmatprep.subr.mxu0 %v5902_v9  ;;  %5407 = vmatprep.mubr.msk.f32.mxu1 %vm5903_vm1, %v5902_v9  ;;  %v579_v42 = vld [vmem:[%s6986_s4 + $0xe0] sm:$0xff]  ;;  %v589_v46 = vld [vmem:[%s6986_s4 + $0x130] sm:$0xff]  ;;  %v568_v47 = vld [vmem:[%s6986_s4 + $0x88] sm:$0xff] }
  0x17   : > { %5421 = vmatprep.subr.mxu1 %v5902_v9  ;;  %v588_v48 = vld [vmem:[%s6986_s4 + $0x128] sm:$0xff]  ;;  %v567_v49 = vld [vmem:[%s6986_s4 + $0x80] sm:$0xff]  ;;  %v578_v51 = vld [vmem:[%s6986_s4 + $0xd8] sm:$0xff] }
  0x18   : > { %v587_v50 = vld [vmem:[%s6986_s4 + $0x120] sm:$0xff]  ;;  %v598_v52 = vld [vmem:[%s6986_s4 + $0x178] sm:$0xff]  ;;  %v577_v53 = vld [vmem:[%s6986_s4 + $0xd0] sm:$0xff] }
  0x19   : > { %v597_v54 = vld [vmem:[%s6986_s4 + $0x170] sm:$0xff]  ;;  %v576_v55 = vld [vmem:[%s6986_s4 + $0xc8] sm:$0xff]  ;;  %v575_v57 = vld [vmem:[%s6986_s4 + $0xc0] sm:$0xff] }
  0x1a   : > { %v596_v56 = vld [vmem:[%s6986_s4 + $0x168] sm:$0xff]  ;;  %v595_v58 = vld [vmem:[%s6986_s4 + $0x160] sm:$0xff]  ;;  %v586_v59 = vld [vmem:[%s6986_s4 + $0x118] sm:$0xff] }
  0x1b   : > { %v585_v60 = vld [vmem:[%s6986_s4 + $0x110] sm:$0xff]  ;;  %v584_v61 = vld [vmem:[%s6986_s4 + $0x108] sm:$0xff]  ;;  %v583_v62 = vld [vmem:[%s6986_s4 + $0x100] sm:$0xff] }
  0x1c   : > { %v594_v63 = vld [vmem:[%s6986_s4 + $0x158] sm:$0xff]  ;;  %v593_v0 = vld [vmem:[%s6986_s4 + $0x150] sm:$0xff]  ;;  %v592_v1 = vld [vmem:[%s6986_s4 + $0x148] sm:$0xff] }
  0x1d   : > { %v591_v3 = vld [vmem:[%s6986_s4 + $0x140] sm:$0xff] }
  0x1e   : > { %v4968_v13 = vld [vmem:[%s6987_s5 + $0x3] ss:$0 sm:$0xff]  ;;  %v4972_v14 = vld [vmem:[%s6987_s5 + $0x7] ss:$0 sm:$0xff] }
  0x9c   : > { %v525_v4 = vpop.xlane.xlu0 %524 }
  0x9d   : > { %v527_v5 = vmul.f32 0.03125, %v525_v4 }
  0x9f   : > { %v528_v6 = vsub.f32 %v6008_v2, %v527_v5 }
  0xa1   : > { %v529_v7 = vmul.f32 %v528_v6, %v528_v6 }
  0xa3   : > { %v530_v8 = vsel %vm522_vm0, %v529_v7, 0.0 }
  0xa4   : > { %531 = vadd.xlane.f32.xlu0 %v530_v8 }
 0x12d   : > { %v532_v18 = vpop.xlane.xlu0 %531 }
 0x12e   : > { %v533_v19 = vmul.f32 0.03125, %v532_v18 }
 0x130   : > { %v534_v20 = vadd.f32 1e-05, %v533_v19 }
 0x132   : > { %5852 = vrsqrt.f32 %v534_v20 }
 0x13f   : > { %v5853_v21 = vpop.eup %5852 }
 0x140   : > { %v536_v23 = vmul.f32 %v5853_v21, %v528_v6 }
 0x142   : > { %v543_v25 = vmul.f32 %v4963_v22, %v536_v23  ;;  %v4965_v22 = vld [vmem:[%s6987_s5] ss:$0 sm:$0xff]  ;;  %v4969_v23 = vld [vmem:[%s6987_s5 + $0x4] ss:$0 sm:$0xff] }
 0x144   : > { %v6058_v26 = vadd.f32 %v4964_v24, %v543_v25  ;;  %v4974_v24 = vld [vmem:[%s6987_s5 + $0x9] ss:$0 sm:$0xff] }
 0x146   : > { %5375 = vmatmul.mubr.msk.f32.vlgmr.msra.gmra.mxu0 %vm522_vm0, %v6058_v26  ;;  %5408 = vmatmul.mubr.msk.f32.vlgmr.msra.gmra.mxu1 %vm522_vm0, %v6058_v26 }
 0x147   : > { %5378 = vmatpush3.msra.mxu0 %v558_v27  ;;  %5422 = vmatpush3.msra.mxu1 %v574_v28  ;;  %v4966_v27 = vld [vmem:[%s6987_s5 + $0x1] ss:$0 sm:$0xff] }
 0x148   : > { %5379 = vmatprep.subr.mxu0 %v5902_v9  ;;  %5423 = vmatprep.subr.mxu1 %v5902_v9 }
 0x149   : > { %5380 = vmatpush3.msra.mxu0 %v557_v29  ;;  %5424 = vmatpush3.msra.mxu1 %v573_v30  ;;  %v4970_v30 = vld [vmem:[%s6987_s5 + $0x5] ss:$0 sm:$0xff] }
 0x14a   : > { %5381 = vmatprep.subr.mxu0 %v5902_v9  ;;  %5425 = vmatprep.subr.mxu1 %v5902_v9 }
 0x14b   : > { %5382 = vmatpush3.msra.mxu0 %v556_v31  ;;  %5426 = vmatpush3.msra.mxu1 %v572_v32 }
 0x14c   : > { %5383 = vmatprep.subr.mxu0 %v5902_v9  ;;  %5427 = vmatprep.subr.mxu1 %v5902_v9 }
 0x14d   : > { %5384 = vmatpush3.msra.mxu0 %v555_v33  ;;  %5385 = vmatprep.mubr.msk.f32.mxu0 %vm5903_vm1, %v5902_v9 }
 0x14e   : > { %5428 = vmatpush3.msra.mxu1 %v571_v34  ;;  %5429 = vmatprep.mubr.msk.f32.mxu1 %vm5903_vm1, %v5902_v9 }
 0x14f   : > { %5386 = vmatmul.mubr.msk.f32.vlgmr.msra.gmra.mxu0 %vm522_vm0, %v6058_v26  ;;  %5388 = vmatprep.subr.mxu0 %v5902_v9 }
 0x150   : > { %5430 = vmatmul.mubr.msk.f32.vlgmr.msra.gmra.mxu1 %vm522_vm0, %v6058_v26  ;;  %5443 = vmatprep.subr.mxu1 %v5902_v9 }
 0x151   : > { %5389 = vmatpush3.msra.mxu0 %v562_v35  ;;  %5444 = vmatpush3.msra.mxu1 %v582_v36 }
 0x152   : > { %5390 = vmatprep.subr.mxu0 %v5902_v9  ;;  %5445 = vmatprep.subr.mxu1 %v5902_v9 }
 0x153   : > { %5391 = vmatpush3.msra.mxu0 %v561_v37  ;;  %5446 = vmatpush3.msra.mxu1 %v581_v38  ;;  %v4967_v37 = vld [vmem:[%s6987_s5 + $0x2] ss:$0 sm:$0xff] }
 0x154   : > { %5392 = vmatprep.subr.mxu0 %v5902_v9  ;;  %5447 = vmatprep.subr.mxu1 %v5902_v9 }
 0x155   : > { %5393 = vmatpush3.msra.mxu0 %v560_v39  ;;  %5448 = vmatpush3.msra.mxu1 %v580_v40  ;;  %v4971_v39 = vld [vmem:[%s6987_s5 + $0x6] ss:$0 sm:$0xff] }
 0x156   : > { %5394 = vmatprep.subr.mxu0 %v5902_v9  ;;  %5449 = vmatprep.subr.mxu1 %v5902_v9 }
 0x157   : > { %5395 = vmatpush3.msra.mxu0 %v559_v41  ;;  %5396 = vmatprep.mubr.msk.f32.mxu0 %vm5903_vm1, %v5902_v9 }
 0x158   : > { %5450 = vmatpush3.msra.mxu1 %v579_v42  ;;  %5451 = vmatprep.mubr.msk.f32.mxu1 %vm5903_vm1, %v5902_v9 }
 0x159   : > { %5397 = vmatmul.mubr.msk.f32.vlgmr.msra.gmra.mxu0 %vm522_vm0, %v6058_v26  ;;  %5410 = vmatprep.subr.mxu0 %v5902_v9 }
 0x15a   : > { %5452 = vmatmul.mubr.msk.f32.vlgmr.msra.gmra.mxu1 %vm522_vm0, %v6058_v26  ;;  %5465 = vmatprep.subr.mxu1 %v5902_v9 }
 0x15b   : > { %5411 = vmatpush3.msra.mxu0 %v570_v43  ;;  %5466 = vmatpush3.msra.mxu1 %v590_v44 }
 0x15c   : > { %5412 = vmatprep.subr.mxu0 %v5902_v9  ;;  %5467 = vmatprep.subr.mxu1 %v5902_v9 }
 0x15d   : > { %5413 = vmatpush3.msra.mxu0 %v569_v45  ;;  %5468 = vmatpush3.msra.mxu1 %v589_v46 }
 0x15e   : > { %5414 = vmatprep.subr.mxu0 %v5902_v9  ;;  %5469 = vmatprep.subr.mxu1 %v5902_v9 }
 0x15f   : > { %5415 = vmatpush3.msra.mxu0 %v568_v47  ;;  %5470 = vmatpush3.msra.mxu1 %v588_v48  ;;  %v4973_v47 = vld [vmem:[%s6987_s5 + $0x8] ss:$0 sm:$0xff] }
 0x160   : > { %5416 = vmatprep.subr.mxu0 %v5902_v9  ;;  %5471 = vmatprep.subr.mxu1 %v5902_v9 }
 0x161   : > { %5417 = vmatpush3.msra.mxu0 %v567_v49  ;;  %5418 = vmatprep.mubr.msk.f32.mxu0 %vm5903_vm1, %v5902_v9 }
 0x162   : > { %5472 = vmatpush3.msra.mxu1 %v587_v50  ;;  %5473 = vmatprep.mubr.msk.f32.mxu1 %vm5903_vm1, %v5902_v9 }
 0x163   : > { %5419 = vmatmul.mubr.msk.f32.vlgmr.msra.gmra.mxu0 %vm522_vm0, %v6058_v26  ;;  %5432 = vmatprep.subr.mxu0 %v5902_v9 }
 0x164   : > { %5474 = vmatmul.mubr.msk.f32.vlgmr.msra.gmra.mxu1 %vm522_vm0, %v6058_v26  ;;  %5487 = vmatprep.subr.mxu1 %v5902_v9 }
 0x165   : > { %5433 = vmatpush3.msra.mxu0 %v578_v51  ;;  %5488 = vmatpush3.msra.mxu1 %v598_v52 }
 0x166   : > { %5434 = vmatprep.subr.mxu0 %v5902_v9  ;;  %5489 = vmatprep.subr.mxu1 %v5902_v9 }
 0x167   : > { %5435 = vmatpush3.msra.mxu0 %v577_v53  ;;  %5490 = vmatpush3.msra.mxu1 %v597_v54 }
 0x168   : > { %5436 = vmatprep.subr.mxu0 %v5902_v9  ;;  %5491 = vmatprep.subr.mxu1 %v5902_v9 }
 0x169   : > { %5437 = vmatpush3.msra.mxu0 %v576_v55  ;;  %5492 = vmatpush3.msra.mxu1 %v596_v56 }
 0x16a   : > { %5438 = vmatprep.subr.mxu0 %v5902_v9  ;;  %5493 = vmatprep.subr.mxu1 %v5902_v9 }
 0x16b   : > { %5439 = vmatpush3.msra.mxu0 %v575_v57  ;;  %5440 = vmatprep.mubr.msk.f32.mxu0 %vm5903_vm1, %v5902_v9 }
 0x16c   : > { %5494 = vmatpush3.msra.mxu1 %v595_v58  ;;  %5495 = vmatprep.mubr.msk.f32.mxu1 %vm5903_vm1, %v5902_v9 }
 0x16d   : > { %5441 = vmatmul.mubr.msk.f32.vlgmr.msra.gmra.mxu0 %vm522_vm0, %v6058_v26  ;;  %5454 = vmatprep.subr.mxu0 %v5902_v9 }
 0x16e   : > { %5496 = vmatmul.mubr.msk.f32.vlgmr.msra.gmra.mxu1 %vm522_vm0, %v6058_v26  ;;  %5455 = vmatpush3.msra.mxu0 %v586_v59 }
 0x16f   : > { %5456 = vmatprep.subr.mxu0 %v5902_v9  ;;  %5462 = vmatprep.mubr.msk.f32.mxu0 %vm5903_vm1, %v5902_v9 }
 0x170   : > { %5457 = vmatpush3.msra.mxu0 %v585_v60  ;;  %5513 = vmatprep.subr.mxu1 %v5902_v9 }
 0x171   : > { %5458 = vmatprep.subr.mxu0 %v5902_v9  ;;  %5515 = vmatprep.mubr.msk.f32.mxu1 %vm5903_vm1, %v5902_v9 }
 0x172   : > { %5459 = vmatpush3.msra.mxu0 %v584_v61 }
 0x173   : > { %5460 = vmatprep.subr.mxu0 %v5902_v9 }
 0x174   : > { %5461 = vmatpush3.msra.mxu0 %v583_v62 }
 0x175   : > { %5463 = vmatmul.mubr.msk.f32.vlgmr.msra.gmra.mxu0 %vm522_vm0, %v6058_v26  ;;  %5476 = vmatprep.subr.mxu0 %v5902_v9 }
 0x176   : > { %5477 = vmatpush3.msra.mxu0 %v594_v63  ;;  %5484 = vmatprep.mubr.msk.f32.mxu0 %vm5903_vm1, %v5902_v9 }
 0x177   : > { %5478 = vmatprep.subr.mxu0 %v5902_v9 }
 0x178   : > { %5479 = vmatpush3.msra.mxu0 %v593_v0 }
 0x179   : > { %5480 = vmatprep.subr.mxu0 %v5902_v9 }
 0x17a   : > { %5481 = vmatpush3.msra.mxu0 %v592_v1 }
 0x17b   : > { %5482 = vmatprep.subr.mxu0 %v5902_v9 }
 0x17c   : > { %5483 = vmatpush3.msra.mxu0 %v591_v3 }
 0x17d   : > { %5485 = vmatmul.mubr.msk.f32.vlgmr.msra.gmra.mxu0 %vm522_vm0, %v6058_v26  ;;  %5498 = vmatprep.subr.mxu0 %v5902_v9 }
 0x17e   : > { %5500 = vmatprep.mubr.msk.f32.mxu0 %vm5903_vm1, %v5902_v9 }
 0x206   : > { %v752_v4 = vpop.f32.mrf.mxu0  ;;  %v962_v5 = vpop.f32.mrf.mxu1 }
 0x207   : > { %v963_v16 = vadd.f32 %v4968_v13, %v962_v5  ;;  %v753_v25 = vadd.f32 %v4965_v22, %v752_v4 }
 0x208   : > { %v5376_v6 = vpop.f32.mrf.mxu0  ;;  %v5409_v7 = vpop.f32.mrf.mxu1 }
 0x209   : > { %v1529_v21 = vmul.f32 0.35355338, %v963_v16  ;;  %v1526_v34 = vmul.f32 0.35355338, %v753_v25 }
 0x20f   : > { %v822_v8 = vpop.f32.mrf.mxu0 }
 0x210   : > { %v1102_v10 = vpop.f32.mrf.mxu1  ;;  %v823_v35 = vadd.f32 %v4966_v27, %v822_v8  ;;  %v4975_v27 = vld [vmem:[%s6987_s5 + $0xa] ss:$0 sm:$0xff] }
 0x211   : > { %v5387_v11 = vpop.f32.mrf.mxu0  ;;  %v1103_v36 = vadd.f32 %v4970_v30, %v1102_v10 }
 0x212   : > { %v5431_v12 = vpop.f32.mrf.mxu1  ;;  %v1527_v38 = vmul.f32 0.35355338, %v823_v35 }
 0x219   : > { %v892_v15 = vpop.f32.mrf.mxu0 }
 0x21a   : > { %v1242_v17 = vpop.f32.mrf.mxu1  ;;  %v893_v40 = vadd.f32 %v4967_v37, %v892_v15 }
 0x21b   : > { %v1243_v18 = vadd.f32 %v4972_v14, %v1242_v17  ;;  %v5398_v19 = vpop.f32.mrf.mxu0 }
 0x21c   : > { %v5453_v20 = vpop.f32.mrf.mxu1  ;;  %v1528_v46 = vmul.f32 0.35355338, %v893_v40  ;;  %v2172_v40 = vld [vmem:[%s6988_s6 + $0x8] sm:$0xff] }
 0x21d   : > { %5514 = vmatpush3.xpose.msk.msra.mxu1 %vm1530_vm2, %v1243_v18 }
 0x21e   : > { %5523 = vmatprep.subr.mxu1 %v5902_v9 }
 0x220   : > { %5516 = vmatmul.mubr.msk.f32.vlgmr.msra.gmra.mxu1 %vm1530_vm2, %v1529_v21 }
 0x221   : > { %5525 = vmatprep.mubr.msk.f32.mxu1 %vm5903_vm1, %v5902_v9 }
 0x223   : > { %v1032_v26 = vpop.f32.mrf.mxu0 }
 0x224   : > { %v1033_v28 = vadd.f32 %v4969_v23, %v1032_v26  ;;  %v1382_v29 = vpop.f32.mrf.mxu1 }
 0x225   : > { %v1383_v31 = vadd.f32 %v4974_v24, %v1382_v29  ;;  %v5420_v32 = vpop.f32.mrf.mxu0 }
 0x226   : > { %v5475_v33 = vpop.f32.mrf.mxu1  ;;  %5499 = vmatpush3.xpose.msk.msra.mxu0 %vm1530_vm2, %v1033_v28 }
 0x227   : > { %5524 = vmatpush3.msra.mxu1 %v1383_v31  ;;  %5503 = vmatprep.subr.mxu0 %v5902_v9  ;;  %v4976_v31 = vld [vmem:[%s6987_s5 + $0xb] ss:$0 sm:$0xff] }
 0x228   : > { %5533 = vmatprep.subr.mxu1 %v5902_v9 }
 0x229   : > { %5501 = vmatmul.mubr.msk.f32.vlgmr.msra.gmra.mxu0 %vm1530_vm2, %v1526_v34 }
 0x22a   : > { %5504 = vmatpush3.xpose.msk.msra.mxu0 %vm1530_vm2, %v1103_v36  ;;  %5505 = vmatprep.mubr.msk.f32.mxu0 %vm5903_vm1, %v5902_v9 }
 0x22b   : > { %5508 = vmatprep.subr.mxu0 %v5902_v9 }
 0x22d   : > { %v1172_v41 = vpop.f32.mrf.mxu0  ;;  %5506 = vmatmul.mubr.msk.f32.vlgmr.msra.gmra.mxu0 %vm1530_vm2, %v1527_v38 }
 0x22e   : > { %v1173_v42 = vadd.f32 %v4971_v39, %v1172_v41  ;;  %v6309_v43 = vpop.f32.mrf.mxu1  ;;  %5510 = vmatprep.mubr.msk.f32.mxu0 %vm5903_vm1, %v5902_v9  ;;  %v2171_v39 = vld [vmem:[%s6988_s6] sm:$0xff]  ;;  %v2173_v41 = vld [vmem:[%s6988_s6 + $0x10] sm:$0xff] }
 0x22f   : > { %v5442_v44 = vpop.f32.mrf.mxu0  ;;  %v1523_v34 = vadd.f32 %v4976_v31, %v6309_v43 }
 0x230   : > { %v5497_v45 = vpop.f32.mrf.mxu1  ;;  %5509 = vmatpush3.xpose.msk.msra.mxu0 %vm1530_vm2, %v1173_v42  ;;  %v2174_v44 = vld [vmem:[%s6988_s6 + $0x18] sm:$0xff] }
 0x231   : > { %5518 = vmatprep.subr.mxu0 %v5902_v9 }
 0x233   : > { %5511 = vmatmul.mubr.msk.f32.vlgmr.msra.gmra.mxu0 %vm1530_vm2, %v1528_v46 }
 0x234   : > { %5520 = vmatprep.mubr.msk.f32.mxu0 %vm5903_vm1, %v5902_v9 }
 0x235   : > { %v1312_v48 = vpop.f32.mrf.mxu0 }
 0x236   : > { %v1313_v49 = vadd.f32 %v4973_v47, %v1312_v48 }
 0x237   : > { %v5464_v50 = vpop.f32.mrf.mxu0 }
 0x238   : > { %5519 = vmatpush3.msra.mxu0 %v1313_v49 }
 0x239   : > { %5528 = vmatprep.subr.mxu0 %v5902_v9 }
 0x23d   : > { %v1452_v51 = vpop.f32.mrf.mxu0 }
 0x23e   : > { %v1453_v30 = vadd.f32 %v4975_v27, %v1452_v51  ;;  %v2601_v27 = vld [vmem:[%s6994_s12 + $0x20] sm:$0xff] }
 0x23f   : > { %v5486_v52 = vpop.f32.mrf.mxu0 }
 0x2e0   : > { %v1831_v53 = vpop.f32.mrf.mxu1 }
 0x2e1   : > { %v1844_v61 = vsel %vm1530_vm2, %v1831_v53, -inf }
 0x2e2   : > { %v5517_v54 = vpop.f32.mrf.mxu1 }
 0x2e9   : > { %v1603_v55 = vpop.f32.mrf.mxu0 }
 0x2ea   : > { %v1835_v56 = vsel %vm1530_vm2, %v1603_v55, -inf }
 0x2eb   : > { %1836 = vmax.xlane.f32.xlu1 %v1835_v56  ;;  %v5502_v57 = vpop.f32.mrf.mxu0 }
 0x2ed   : > { %v1679_v58 = vpop.f32.mrf.mxu0 }
 0x2ee   : > { %v1838_v59 = vsel %vm1530_vm2, %v1679_v58, -inf }
 0x2ef   : > { %1839 = vmax.xlane.f32.xlu1 %v1838_v59  ;;  %v5507_v60 = vpop.f32.mrf.mxu0 }
 0x2f3   : > { %v1755_v62 = vpop.f32.mrf.mxu0  ;;  %1845 = vmax.xlane.f32.xlu1 %v1844_v61 }
 0x2f4   : > { %v1841_v63 = vsel %vm1530_vm2, %v1755_v62, -inf }
 0x2f5   : > { %1842 = vmax.xlane.f32.xlu0 %v1841_v63  ;;  %v5512_v0 = vpop.f32.mrf.mxu0 }
 0x374   : > { %v1837_v1 = vpop.xlane.xlu1 %1836 }
 0x375   : > { %v1847_v3 = vsub.f32 %v1603_v55, %v1837_v1 }
 0x377   : > { %v1851_v4 = vmul.f32 1.442695, %v1847_v3  ;;  %v5005_v3 = vld [vmem:[%s6989_s7] ss:$0 sm:$0xff] }
 0x378   : > { %v1840_v5 = vpop.xlane.xlu1 %1839 }
 0x379   : > { %5854 = vpow2.f32 %v1851_v4  ;;  %v1848_v6 = vsub.f32 %v1679_v58, %v1840_v5 }
 0x37b   : > { %v1853_v7 = vmul.f32 1.442695, %v1848_v6 }
 0x37c   : > { %v1846_v8 = vpop.xlane.xlu1 %1845 }
 0x37d   : > { %5856 = vpow2.f32 %v1853_v7  ;;  %v1850_v10 = vsub.f32 %v1831_v53, %v1846_v8 }
 0x37e   : > { %v1843_v11 = vpop.xlane.xlu0 %1842 }
 0x37f   : > { %v1857_v12 = vmul.f32 1.442695, %v1850_v10  ;;  %v1849_v13 = vsub.f32 %v1755_v62, %v1843_v11 }
 0x381   : > { %5858 = vpow2.f32 %v1857_v12  ;;  %v1855_v14 = vmul.f32 1.442695, %v1849_v13  ;;  %v2515_v13 = vld [vmem:[%s6992_s10 + $0x18] sm:$0xff] }
 0x383   : > { %5860 = vpow2.f32 %v1855_v14  ;;  %v2513_v14 = vld [vmem:[%s6992_s10 + $0x8] sm:$0xff] }
 0x386   : > { %v5855_v15 = vpop.eup %5854 }
 0x387   : > { %v1859_v16 = vsel %vm1530_vm2, %v5855_v15, 0.0 }
 0x388   : > { %1860 = vadd.xlane.f32.xlu0 %v1859_v16  ;;  %v2612_v16 = vld [vmem:[%s6994_s12 + $0x78] sm:$0xff] }
 0x38a   : > { %v5857_v17 = vpop.eup %5856 }
 0x38b   : > { %v1862_v18 = vsel %vm1530_vm2, %v5857_v17, 0.0 }
 0x38c   : > { %1863 = vadd.xlane.f32.xlu1 %v1862_v18  ;;  %v2610_v18 = vld [vmem:[%s6994_s12 + $0x68] sm:$0xff] }
 0x38e   : > { %v5859_v19 = vpop.eup %5858 }
 0x38f   : > { %v1868_v20 = vsel %vm1530_vm2, %v5859_v19, 0.0 }
 0x390   : > { %v5861_v21 = vpop.eup %5860  ;;  %1869 = vadd.xlane.f32.xlu1 %v1868_v20  ;;  %v2608_v20 = vld [vmem:[%s6994_s12 + $0x58] sm:$0xff] }
 0x391   : > { %v1865_v22 = vsel %vm1530_vm2, %v5861_v21, 0.0 }
 0x392   : > { %1866 = vadd.xlane.f32.xlu0 %v1865_v22  ;;  %v2606_v22 = vld [vmem:[%s6994_s12 + $0x48] sm:$0xff] }
 0x411   : > { %v1861_v23 = vpop.xlane.xlu0 %1860 }
 0x412   : > { %5862 = vrcp.f32 %v1861_v23  ;;  %v2605_v23 = vld [vmem:[%s6994_s12 + $0x40] sm:$0xff] }
 0x415   : > { %v1864_v24 = vpop.xlane.xlu1 %1863 }
 0x416   : > { %5864 = vrcp.f32 %v1864_v24  ;;  %v2604_v24 = vld [vmem:[%s6994_s12 + $0x38] sm:$0xff] }
 0x419   : > { %v1870_v25 = vpop.xlane.xlu1 %1869 }
 0x41a   : > { %5866 = vrcp.f32 %v1870_v25  ;;  %v2603_v25 = vld [vmem:[%s6994_s12 + $0x30] sm:$0xff] }
 0x41b   : > { %v1867_v26 = vpop.xlane.xlu0 %1866 }
 0x41c   : > { %5868 = vrcp.f32 %v1867_v26  ;;  %v2602_v26 = vld [vmem:[%s6994_s12 + $0x28] sm:$0xff] }
 0x41f   : > { %v5863_v28 = vpop.eup %5862 }
 0x420   : > { %v1875_v29 = vmul.f32 %v5863_v28, %v5855_v15  ;;  %v2512_v15 = vld [vmem:[%s6992_s10] sm:$0xff]  ;;  %v2600_v28 = vld [vmem:[%s6994_s12 + $0x18] sm:$0xff] }
 0x422   : > { %5521 = vmatmul.mubr.msk.f32.vlgmr.msra.gmra.mxu0 %vm1530_vm2, %v1875_v29 }
 0x423   : > { %v5865_v32 = vpop.eup %5864  ;;  %5529 = vmatpush3.msra.mxu0 %v1453_v30  ;;  %5530 = vmatprep.mubr.msk.f32.mxu0 %vm5903_vm1, %v5902_v9 }
 0x424   : > { %v1876_v33 = vmul.f32 %v5865_v32, %v5857_v17  ;;  %5538 = vmatprep.subr.mxu0 %v5902_v9  ;;  %v2611_v17 = vld [vmem:[%s6994_s12 + $0x70] sm:$0xff] }
 0x426   : > { %5526 = vmatmul.mubr.msk.f32.vlgmr.msra.gmra.mxu1 %vm1530_vm2, %v1876_v33  ;;  %v5006_v33 = vld [vmem:[%s6990_s8] ss:$0 sm:$0xff] }
 0x427   : > { %v5867_v35 = vpop.eup %5866  ;;  %5534 = vmatpush3.msra.mxu1 %v1523_v34  ;;  %5535 = vmatprep.mubr.msk.f32.mxu1 %vm5903_vm1, %v5902_v9 }
 0x428   : > { %v1878_v36 = vmul.f32 %v5867_v35, %v5859_v19  ;;  %5543 = vmatprep.subr.mxu1 %v5902_v9  ;;  %v2609_v19 = vld [vmem:[%s6994_s12 + $0x60] sm:$0xff] }
 0x429   : > { %v5869_v37 = vpop.eup %5868  ;;  %v5007_v35 = vld [vmem:[%s6991_s9] ss:$0 sm:$0xff] }
 0x42a   : > { %v1877_v38 = vmul.f32 %v5869_v37, %v5861_v21  ;;  %5536 = vmatmul.mubr.msk.f32.vlgmr.msra.gmra.mxu1 %vm1530_vm2, %v1878_v36  ;;  %v2607_v21 = vld [vmem:[%s6994_s12 + $0x50] sm:$0xff] }
 0x42b   : > { %5545 = vmatprep.mubr.msk.f32.mxu1 %vm5903_vm1, %v5902_v9  ;;  %5544 = vmatpush3.msra.mxu1 %v2172_v40  ;;  %v2597_v40 = vld [vmem:[%s6994_s12] sm:$0xff] }
 0x42c   : > { %5531 = vmatmul.mubr.msk.f32.vlgmr.msra.gmra.mxu0 %vm1530_vm2, %v1877_v38  ;;  %5553 = vmatprep.subr.mxu1 %v5902_v9  ;;  %v2599_v38 = vld [vmem:[%s6994_s12 + $0x10] sm:$0xff] }
 0x42d   : > { %5540 = vmatprep.mubr.msk.f32.mxu0 %vm5903_vm1, %v5902_v9  ;;  %5539 = vmatpush3.msra.mxu0 %v2171_v39  ;;  %v2598_v39 = vld [vmem:[%s6994_s12 + $0x8] sm:$0xff] }
 0x42e   : > { %5548 = vmatprep.subr.mxu0 %v5902_v9 }
 0x4e2   : > { %v1948_v42 = vpop.f32.mrf.mxu0 }
 0x4e3   : > { %5541 = vmatmul.mubr.msk.f32.vlgmr.msra.gmra.mxu0 %vm1530_vm2, %v1948_v42 }
 0x4e4   : > { %v5522_v43 = vpop.f32.mrf.mxu0  ;;  %5549 = vmatpush3.msra.mxu0 %v2173_v41  ;;  %5550 = vmatprep.mubr.msk.f32.mxu0 %vm5903_vm1, %v5902_v9  ;;  %v5008_v41 = vld [vmem:[%s6993_s11] ss:$0 sm:$0xff] }
 0x4e5   : > { %5558 = vmatprep.subr.mxu0 %v5902_v9 }
 0x4e6   : > { %v2021_v45 = vpop.f32.mrf.mxu1 }
 0x4e7   : > { %5546 = vmatmul.mubr.msk.f32.vlgmr.msra.gmra.mxu1 %vm1530_vm2, %v2021_v45 }
 0x4e8   : > { %v5527_v46 = vpop.f32.mrf.mxu1  ;;  %5554 = vmatpush3.msra.mxu1 %v2174_v44  ;;  %5555 = vmatprep.mubr.msk.f32.mxu1 %vm5903_vm1, %v5902_v9 }
 0x4e9   : > { %5569 = vmatprep.subr.mxu1 %v5902_v9 }
 0x4ea   : > { %v2167_v47 = vpop.f32.mrf.mxu1 }
 0x4eb   : > { %5556 = vmatmul.mubr.msk.f32.vlgmr.msra.gmra.mxu1 %vm1530_vm2, %v2167_v47  ;;  %v5010_v47 = vld [vmem:[%s6995_s13] ss:$0 sm:$0xff] }
 0x4ec   : > { %v2094_v48 = vpop.f32.mrf.mxu0  ;;  %v5537_v49 = vpop.f32.mrf.mxu1  ;;  %5601 = vmatprep.mubr.msk.f32.mxu1 %vm5903_vm1, %v5902_v9  ;;  %5570 = vmatpush3.msra.mxu1 %v2612_v16  ;;  %v5040_v16 = vld [vmem:[%s6986_s4 + $0x248] sm:$0xff] }
 0x4ed   : > { %5551 = vmatmul.mubr.msk.f32.vlgmr.msra.gmra.mxu0 %vm1530_vm2, %v2094_v48  ;;  %5571 = vmatprep.subr.mxu1 %v5902_v9 }
 0x4ee   : > { %v5532_v50 = vpop.f32.mrf.mxu0  ;;  %5566 = vmatprep.mubr.msk.f32.mxu0 %vm5903_vm1, %v5902_v9  ;;  %5559 = vmatpush3.msra.mxu0 %v2515_v13  ;;  %v5042_v13 = vld [vmem:[%s6986_s4 + $0x258] sm:$0xff] }
 0x4ef   : > { %5560 = vmatprep.subr.mxu0 %v5902_v9  ;;  %5572 = vmatpush3.msra.mxu1 %v2611_v17  ;;  %v5019_v17 = vld [vmem:[%s6986_s4 + $0x1a0] sm:$0xff] }
 0x4f0   : > { %5573 = vmatprep.subr.mxu1 %v5902_v9 }
 0x4f1   : > { %5574 = vmatpush3.msra.mxu1 %v2610_v18  ;;  %v5039_v18 = vld [vmem:[%s6986_s4 + $0x240] sm:$0xff] }
 0x4f2   : > { %5575 = vmatprep.subr.mxu1 %v5902_v9 }
 0x4f3   : > { %5576 = vmatpush3.msra.mxu1 %v2609_v19  ;;  %v5026_v19 = vld [vmem:[%s6986_s4 + $0x1d8] sm:$0xff] }
 0x4f4   : > { %5577 = vmatprep.subr.mxu1 %v5902_v9 }
 0x4f5   : > { %5578 = vmatpush3.msra.mxu1 %v2608_v20  ;;  %v5050_v20 = vld [vmem:[%s6986_s4 + $0x298] sm:$0xff] }
 0x4f6   : > { %5579 = vmatprep.subr.mxu1 %v5902_v9 }
 0x4f7   : > { %5580 = vmatpush3.msra.mxu1 %v2607_v21  ;;  %v5025_v21 = vld [vmem:[%s6986_s4 + $0x1d0] sm:$0xff] }
 0x4f8   : > { %5581 = vmatprep.subr.mxu1 %v5902_v9 }
 0x4f9   : > { %5582 = vmatpush3.msra.mxu1 %v2606_v22  ;;  %v5049_v22 = vld [vmem:[%s6986_s4 + $0x290] sm:$0xff] }
 0x4fa   : > { %5583 = vmatprep.subr.mxu1 %v5902_v9 }
 0x4fb   : > { %5584 = vmatpush3.msra.mxu1 %v2605_v23  ;;  %v5024_v23 = vld [vmem:[%s6986_s4 + $0x1c8] sm:$0xff] }
 0x4fc   : > { %5585 = vmatprep.subr.mxu1 %v5902_v9 }
 0x4fd   : > { %5586 = vmatpush3.msra.mxu1 %v2604_v24  ;;  %v5048_v24 = vld [vmem:[%s6986_s4 + $0x288] sm:$0xff] }
 0x4fe   : > { %5587 = vmatprep.subr.mxu1 %v5902_v9 }
 0x4ff   : > { %5588 = vmatpush3.msra.mxu1 %v2603_v25  ;;  %v5023_v25 = vld [vmem:[%s6986_s4 + $0x1c0] sm:$0xff] }
 0x500   : > { %5589 = vmatprep.subr.mxu1 %v5902_v9 }
 0x501   : > { %5590 = vmatpush3.msra.mxu1 %v2602_v26  ;;  %v5047_v26 = vld [vmem:[%s6986_s4 + $0x280] sm:$0xff] }
 0x502   : > { %5591 = vmatprep.subr.mxu1 %v5902_v9 }
 0x503   : > { %5592 = vmatpush3.msra.mxu1 %v2601_v27  ;;  %v5030_v27 = vld [vmem:[%s6986_s4 + $0x1f8] sm:$0xff] }
 0x504   : > { %5593 = vmatprep.subr.mxu1 %v5902_v9 }
 0x505   : > { %5594 = vmatpush3.msra.mxu1 %v2600_v28  ;;  %v5058_v28 = vld [vmem:[%s6986_s4 + $0x2d8] sm:$0xff] }
 0x506   : > { %5595 = vmatprep.subr.mxu1 %v5902_v9 }
 0x507   : > { %5596 = vmatpush3.msra.mxu1 %v2599_v38  ;;  %v5035_v38 = vld [vmem:[%s6986_s4 + $0x220] sm:$0xff] }
 0x508   : > { %5597 = vmatprep.subr.mxu1 %v5902_v9 }
 0x509   : > { %5598 = vmatpush3.msra.mxu1 %v2598_v39  ;;  %v5046_v39 = vld [vmem:[%s6986_s4 + $0x278] sm:$0xff] }
 0x50a   : > { %5599 = vmatprep.subr.mxu1 %v5902_v9 }
 0x50b   : > { %5600 = vmatpush3.msra.mxu1 %v2597_v40  ;;  %v5045_v40 = vld [vmem:[%s6986_s4 + $0x270] sm:$0xff] }
 0x50c   : > { %5648 = vmatprep.subr.mxu1 %v5902_v9 }
 0x5a3   : > { %v2244_v51 = vpop.f32.mrf.mxu0 }
 0x5a4   : > { %v2467_v57 = vsel %vm522_vm0, %v2244_v51, 0.0 }
 0x5a5   : > { %v5542_v52 = vpop.f32.mrf.mxu0 }
 0x5a7   : > { %v2317_v53 = vpop.f32.mrf.mxu1 }
 0x5a8   : > { %v2468_v55 = vsel %vm522_vm0, %v2317_v53, 0.0 }
 0x5a9   : > { %v5547_v54 = vpop.f32.mrf.mxu1  ;;  %v2469_v58 = vadd.f32 %v2468_v55, %v2467_v57  ;;  %v5018_v57 = vld [vmem:[%s6986_s4 + $0x198] sm:$0xff] }
 0x5ab   : > { %v2463_v56 = vpop.f32.mrf.mxu1 }
 0x5ac   : > { %v2472_v0 = vsel %vm522_vm0, %v2463_v56, 0.0 }
 0x5ad   : > { %v2390_v59 = vpop.f32.mrf.mxu0  ;;  %v5557_v60 = vpop.f32.mrf.mxu1 }
 0x5ae   : > { %v2470_v61 = vsel %vm522_vm0, %v2390_v59, 0.0  ;;  %v5017_v59 = vld [vmem:[%s6986_s4 + $0x190] sm:$0xff] }
 0x5af   : > { %v2471_v62 = vadd.f32 %v2470_v61, %v2469_v58  ;;  %v5552_v63 = vpop.f32.mrf.mxu0  ;;  %v5034_v58 = vld [vmem:[%s6986_s4 + $0x218] sm:$0xff]  ;;  %v5033_v60 = vld [vmem:[%s6986_s4 + $0x210] sm:$0xff]  ;;  %v5016_v61 = vld [vmem:[%s6986_s4 + $0x188] sm:$0xff] }
 0x5b0   : > { %v5015_v63 = vld [vmem:[%s6986_s4 + $0x180] sm:$0xff] }
 0x5b1   : > { %v2473_v1 = vadd.f32 %v2472_v0, %v2471_v62  ;;  %v5032_v62 = vld [vmem:[%s6986_s4 + $0x208] sm:$0xff]  ;;  %v5031_v0 = vld [vmem:[%s6986_s4 + $0x200] sm:$0xff] }
 0x5b3   : > { %v2474_v4 = vadd.f32 %v2473_v1, %v6008_v2  ;;  %v2514_v2 = vld [vmem:[%s6992_s10 + $0x10] sm:$0xff] }
 0x5b4   : > { %5561 = vmatpush3.msra.mxu0 %v2514_v2  ;;  %v5021_v2 = vld [vmem:[%s6986_s4 + $0x1b0] sm:$0xff] }
 0x5b5   : > { %v6387_v5 = vadd.f32 %v5005_v3, %v2474_v4  ;;  %5562 = vmatprep.subr.mxu0 %v5902_v9 }
 0x5b6   : > { %5563 = vmatpush3.msra.mxu0 %v2513_v14  ;;  %v5041_v14 = vld [vmem:[%s6986_s4 + $0x250] sm:$0xff] }
 0x5b7   : > { %v2485_v6 = vsel %vm522_vm0, %v6387_v5, 0.0  ;;  %5564 = vmatprep.subr.mxu0 %v5902_v9 }
 0x5b8   : > { %2486 = vadd.xlane.f32.xlu0 %v2485_v6  ;;  %5565 = vmatpush3.msra.mxu0 %v2512_v15  ;;  %v5013_v6 = vld [vmem:[%s6984_s2 + $0x1] ss:$0 sm:$0xff]  ;;  %v5020_v15 = vld [vmem:[%s6986_s4 + $0x1a8] sm:$0xff] }
 0x5b9   : > { %5604 = vmatprep.subr.mxu0 %v5902_v9 }
 0x641   : > { %v2487_v7 = vpop.xlane.xlu0 %2486 }
 0x642   : > { %v2488_v8 = vmul.f32 0.03125, %v2487_v7 }
 0x644   : > { %v2489_v10 = vsub.f32 %v6387_v5, %v2488_v8  ;;  %v5014_v8 = vld [vmem:[%s6985_s3 + $0x1] ss:$0 sm:$0xff] }
 0x646   : > { %v2490_v11 = vmul.f32 %v2489_v10, %v2489_v10 }
 0x648   : > { %v2491_v12 = vsel %vm522_vm0, %v2490_v11, 0.0 }
 0x649   : > { %2492 = vadd.xlane.f32.xlu1 %v2491_v12  ;;  %v5022_v12 = vld [vmem:[%s6986_s4 + $0x1b8] sm:$0xff] }
 0x6d2   : > { %v2493_v29 = vpop.xlane.xlu1 %2492 }
 0x6d3   : > { %v2494_v30 = vmul.f32 0.03125, %v2493_v29  ;;  %v5029_v29 = vld [vmem:[%s6986_s4 + $0x1f0] sm:$0xff] }
 0x6d5   : > { %v2495_v31 = vadd.f32 1e-05, %v2494_v30  ;;  %v5057_v30 = vld [vmem:[%s6986_s4 + $0x2d0] sm:$0xff] }
 0x6d7   : > { %5870 = vrsqrt.f32 %v2495_v31  ;;  %v5028_v31 = vld [vmem:[%s6986_s4 + $0x1e8] sm:$0xff] }
 0x6e4   : > { %v5871_v32 = vpop.eup %5870 }
 0x6e5   : > { %v2497_v34 = vmul.f32 %v5871_v32, %v2489_v10  ;;  %v5056_v32 = vld [vmem:[%s6986_s4 + $0x2c8] sm:$0xff] }
 0x6e7   : > { %v2504_v36 = vmul.f32 %v5006_v33, %v2497_v34  ;;  %v5027_v33 = vld [vmem:[%s6986_s4 + $0x1e0] sm:$0xff] }
 0x6e8   : > { %v5055_v34 = vld [vmem:[%s6986_s4 + $0x2c0] sm:$0xff] }
 0x6e9   : > { %v2511_v37 = vadd.f32 %v5007_v35, %v2504_v36  ;;  %v5038_v35 = vld [vmem:[%s6986_s4 + $0x238] sm:$0xff]  ;;  %v5037_v36 = vld [vmem:[%s6986_s4 + $0x230] sm:$0xff] }
 0x6eb   : > { %5567 = vmatmul.mubr.msk.f32.vlgmr.msra.gmra.mxu0 %vm522_vm0, %v2511_v37  ;;  %v5036_v37 = vld [vmem:[%s6986_s4 + $0x228] sm:$0xff] }
 0x6ec   : > { %5612 = vmatprep.mubr.msk.f32.mxu0 %vm5903_vm1, %v5902_v9  ;;  %5605 = vmatpush3.msra.mxu0 %v5018_v57 }
 0x6ed   : > { %5606 = vmatprep.subr.mxu0 %v5902_v9 }
 0x6ee   : > { %5607 = vmatpush3.msra.mxu0 %v5017_v59 }
 0x6ef   : > { %5608 = vmatprep.subr.mxu0 %v5902_v9 }
 0x6f0   : > { %5609 = vmatpush3.msra.mxu0 %v5016_v61  ;;  %v5081_v61 = vld [vmem:[%s6987_s5 + $0x12] ss:$0 sm:$0xff] }
 0x6f1   : > { %5610 = vmatprep.subr.mxu0 %v5902_v9 }
 0x6f2   : > { %5611 = vmatpush3.msra.mxu0 %v5015_v63 }
 0x6f3   : > { %5615 = vmatprep.subr.mxu0 %v5902_v9 }
 0x7ab   : > { %v2592_v42 = vpop.f32.mrf.mxu0 }
 0x7ac   : > { %v2593_v43 = vadd.f32 %v5008_v41, %v2592_v42  ;;  %v5044_v41 = vld [vmem:[%s6986_s4 + $0x268] sm:$0xff]  ;;  %v5043_v42 = vld [vmem:[%s6986_s4 + $0x260] sm:$0xff] }
 0x7ad   : > { %v5568_v44 = vpop.f32.mrf.mxu0 }
 0x7ae   : > { %v2596_v45 = vmax.f32 %v2593_v43, 0.0  ;;  %v5054_v43 = vld [vmem:[%s6986_s4 + $0x2b8] sm:$0xff]  ;;  %v5053_v44 = vld [vmem:[%s6986_s4 + $0x2b0] sm:$0xff] }
 0x7b0   : > { %5602 = vmatmul.mubr.f32.vlgmr.msra.gmra.mxu1 %v2596_v45  ;;  %v5052_v45 = vld [vmem:[%s6986_s4 + $0x2a8] sm:$0xff] }
 0x7b1   : > { %5656 = vmatprep.mubr.msk.f32.mxu1 %vm5903_vm1, %v5902_v9  ;;  %5649 = vmatpush3.msra.mxu1 %v5034_v58 }
 0x7b2   : > { %5650 = vmatprep.subr.mxu1 %v5902_v9 }
 0x7b3   : > { %5651 = vmatpush3.msra.mxu1 %v5033_v60 }
 0x7b4   : > { %5652 = vmatprep.subr.mxu1 %v5902_v9 }
 0x7b5   : > { %5653 = vmatpush3.msra.mxu1 %v5032_v62 }
 0x7b6   : > { %5654 = vmatprep.subr.mxu1 %v5902_v9 }
 0x7b7   : > { %5655 = vmatpush3.msra.mxu1 %v5031_v0 }
 0x7b8   : > { %5670 = vmatprep.subr.mxu1 %v5902_v9 }
 0x870   : > { %v2679_v46 = vpop.f32.mrf.mxu1 }
 0x871   : > { %v2683_v48 = vadd.f32 %v2679_v46, %v6387_v5  ;;  %v5051_v46 = vld [vmem:[%s6986_s4 + $0x2a0] sm:$0xff] }
 0x872   : > { %v5603_v49 = vpop.f32.mrf.mxu1 }
 0x873   : > { %v6491_v50 = vadd.f32 %v5010_v47, %v2683_v48  ;;  %v5062_v47 = vld [vmem:[%s6986_s4 + $0x2f8] sm:$0xff]  ;;  %v5061_v48 = vld [vmem:[%s6986_s4 + $0x2f0] sm:$0xff]  ;;  %v5060_v49 = vld [vmem:[%s6986_s4 + $0x2e8] sm:$0xff] }
 0x875   : > { %v2696_v51 = vsel %vm522_vm0, %v6491_v50, 0.0 }
 0x876   : > { %2697 = vadd.xlane.f32.xlu0 %v2696_v51  ;;  %v5059_v51 = vld [vmem:[%s6986_s4 + $0x2e0] sm:$0xff] }
 0x8ff   : > { %v2698_v52 = vpop.xlane.xlu0 %2697 }
 0x900   : > { %v2699_v53 = vmul.f32 0.03125, %v2698_v52  ;;  %v5075_v52 = vld [vmem:[%s6987_s5 + $0xc] ss:$0 sm:$0xff] }
 0x902   : > { %v2700_v54 = vsub.f32 %v6491_v50, %v2699_v53  ;;  %v5079_v53 = vld [vmem:[%s6987_s5 + $0x10] ss:$0 sm:$0xff] }
 0x904   : > { %v2701_v55 = vmul.f32 %v2700_v54, %v2700_v54 }
 0x906   : > { %v2702_v56 = vsel %vm522_vm0, %v2701_v55, 0.0 }
 0x907   : > { %2703 = vadd.xlane.f32.xlu1 %v2702_v56 }
 0x990   : > { %v2704_v1 = vpop.xlane.xlu1 %2703 }
 0x991   : > { %v2705_v3 = vmul.f32 0.03125, %v2704_v1 }
 0x993   : > { %v2706_v4 = vadd.f32 1e-05, %v2705_v3 }
 0x995   : > { %5872 = vrsqrt.f32 %v2706_v4  ;;  %v5077_v4 = vld [vmem:[%s6987_s5 + $0xe] ss:$0 sm:$0xff] }
 0x9a2   : > { %v5873_v5 = vpop.eup %5872 }
 0x9a3   : > { %v2708_v7 = vmul.f32 %v5873_v5, %v2700_v54 }
 0x9a5   : > { %v2715_v10 = vmul.f32 %v5013_v6, %v2708_v7  ;;  %v5083_v7 = vld [vmem:[%s6987_s5 + $0x14] ss:$0 sm:$0xff] }
 0x9a7   : > { %v6535_v11 = vadd.f32 %v5014_v8, %v2715_v10 }
 0x9a9   : > { %5613 = vmatmul.mubr.msk.f32.vlgmr.msra.gmra.mxu0 %vm522_vm0, %v6535_v11  ;;  %5657 = vmatmul.mubr.msk.f32.vlgmr.msra.gmra.mxu1 %vm522_vm0, %v6535_v11 }
 0x9aa   : > { %5616 = vmatpush3.msra.mxu0 %v5022_v12  ;;  %5671 = vmatpush3.msra.mxu1 %v5042_v13 }
 0x9ab   : > { %5617 = vmatprep.subr.mxu0 %v5902_v9  ;;  %5672 = vmatprep.subr.mxu1 %v5902_v9 }
 0x9ac   : > { %5618 = vmatpush3.msra.mxu0 %v5021_v2  ;;  %5673 = vmatpush3.msra.mxu1 %v5041_v14 }
 0x9ad   : > { %5619 = vmatprep.subr.mxu0 %v5902_v9  ;;  %5674 = vmatprep.subr.mxu1 %v5902_v9 }
 0x9ae   : > { %5620 = vmatpush3.msra.mxu0 %v5020_v15  ;;  %5675 = vmatpush3.msra.mxu1 %v5040_v16 }
 0x9af   : > { %5621 = vmatprep.subr.mxu0 %v5902_v9  ;;  %5676 = vmatprep.subr.mxu1 %v5902_v9 }
 0x9b0   : > { %5622 = vmatpush3.msra.mxu0 %v5019_v17  ;;  %5623 = vmatprep.mubr.msk.f32.mxu0 %vm5903_vm1, %v5902_v9  ;;  %v5076_v17 = vld [vmem:[%s6987_s5 + $0xd] ss:$0 sm:$0xff] }
 0x9b1   : > { %5677 = vmatpush3.msra.mxu1 %v5039_v18  ;;  %5678 = vmatprep.mubr.msk.f32.mxu1 %vm5903_vm1, %v5902_v9  ;;  %v5080_v18 = vld [vmem:[%s6987_s5 + $0x11] ss:$0 sm:$0xff] }
 0x9b2   : > { %5624 = vmatmul.mubr.msk.f32.vlgmr.msra.gmra.mxu0 %vm522_vm0, %v6535_v11  ;;  %5626 = vmatprep.subr.mxu0 %v5902_v9 }
 0x9b3   : > { %5679 = vmatmul.mubr.msk.f32.vlgmr.msra.gmra.mxu1 %vm522_vm0, %v6535_v11  ;;  %5692 = vmatprep.subr.mxu1 %v5902_v9 }
 0x9b4   : > { %5627 = vmatpush3.msra.mxu0 %v5026_v19  ;;  %5693 = vmatpush3.msra.mxu1 %v5050_v20 }
 0x9b5   : > { %5628 = vmatprep.subr.mxu0 %v5902_v9  ;;  %5694 = vmatprep.subr.mxu1 %v5902_v9 }
 0x9b6   : > { %5629 = vmatpush3.msra.mxu0 %v5025_v21  ;;  %5695 = vmatpush3.msra.mxu1 %v5049_v22 }
 0x9b7   : > { %5630 = vmatprep.subr.mxu0 %v5902_v9  ;;  %5696 = vmatprep.subr.mxu1 %v5902_v9 }
 0x9b8   : > { %5631 = vmatpush3.msra.mxu0 %v5024_v23  ;;  %5697 = vmatpush3.msra.mxu1 %v5048_v24  ;;  %v5078_v24 = vld [vmem:[%s6987_s5 + $0xf] ss:$0 sm:$0xff] }
 0x9b9   : > { %5632 = vmatprep.subr.mxu0 %v5902_v9  ;;  %5698 = vmatprep.subr.mxu1 %v5902_v9 }
 0x9ba   : > { %5633 = vmatpush3.msra.mxu0 %v5023_v25  ;;  %5634 = vmatprep.mubr.msk.f32.mxu0 %vm5903_vm1, %v5902_v9  ;;  %v5082_v25 = vld [vmem:[%s6987_s5 + $0x13] ss:$0 sm:$0xff] }
 0x9bb   : > { %5699 = vmatpush3.msra.mxu1 %v5047_v26  ;;  %5700 = vmatprep.mubr.msk.f32.mxu1 %vm5903_vm1, %v5902_v9 }
 0x9bc   : > { %5635 = vmatmul.mubr.msk.f32.vlgmr.msra.gmra.mxu0 %vm522_vm0, %v6535_v11  ;;  %5637 = vmatprep.subr.mxu0 %v5902_v9 }
 0x9bd   : > { %5701 = vmatmul.mubr.msk.f32.vlgmr.msra.gmra.mxu1 %vm522_vm0, %v6535_v11  ;;  %5714 = vmatprep.subr.mxu1 %v5902_v9 }
 0x9be   : > { %5638 = vmatpush3.msra.mxu0 %v5030_v27  ;;  %5715 = vmatpush3.msra.mxu1 %v5058_v28 }
 0x9bf   : > { %5639 = vmatprep.subr.mxu0 %v5902_v9  ;;  %5716 = vmatprep.subr.mxu1 %v5902_v9 }
 0x9c0   : > { %5640 = vmatpush3.msra.mxu0 %v5029_v29  ;;  %5717 = vmatpush3.msra.mxu1 %v5057_v30 }
 0x9c1   : > { %5641 = vmatprep.subr.mxu0 %v5902_v9  ;;  %5718 = vmatprep.subr.mxu1 %v5902_v9 }
 0x9c2   : > { %5642 = vmatpush3.msra.mxu0 %v5028_v31  ;;  %5719 = vmatpush3.msra.mxu1 %v5056_v32  ;;  %v5084_v31 = vld [vmem:[%s6987_s5 + $0x15] ss:$0 sm:$0xff] }
 0x9c3   : > { %5643 = vmatprep.subr.mxu0 %v5902_v9  ;;  %5720 = vmatprep.subr.mxu1 %v5902_v9 }
 0x9c4   : > { %5644 = vmatpush3.msra.mxu0 %v5027_v33  ;;  %5645 = vmatprep.mubr.msk.f32.mxu0 %vm5903_vm1, %v5902_v9 }
 0x9c5   : > { %5721 = vmatpush3.msra.mxu1 %v5055_v34  ;;  %5722 = vmatprep.mubr.msk.f32.mxu1 %vm5903_vm1, %v5902_v9 }
 0x9c6   : > { %5646 = vmatmul.mubr.msk.f32.vlgmr.msra.gmra.mxu0 %vm522_vm0, %v6535_v11  ;;  %5659 = vmatprep.subr.mxu0 %v5902_v9 }
 0x9c7   : > { %5723 = vmatmul.mubr.msk.f32.vlgmr.msra.gmra.mxu1 %vm522_vm0, %v6535_v11  ;;  %5660 = vmatpush3.msra.mxu0 %v5038_v35 }
 0x9c8   : > { %5661 = vmatprep.subr.mxu0 %v5902_v9  ;;  %5667 = vmatprep.mubr.msk.f32.mxu0 %vm5903_vm1, %v5902_v9 }
 0x9c9   : > { %5662 = vmatpush3.msra.mxu0 %v5037_v36  ;;  %5736 = vmatprep.subr.mxu1 %v5902_v9 }
 0x9ca   : > { %5663 = vmatprep.subr.mxu0 %v5902_v9  ;;  %5738 = vmatprep.mubr.msk.f32.mxu1 %vm5903_vm1, %v5902_v9 }
 0x9cb   : > { %5664 = vmatpush3.msra.mxu0 %v5036_v37 }
 0x9cc   : > { %5665 = vmatprep.subr.mxu0 %v5902_v9 }
 0x9cd   : > { %5666 = vmatpush3.msra.mxu0 %v5035_v38 }
 0x9ce   : > { %5668 = vmatmul.mubr.msk.f32.vlgmr.msra.gmra.mxu0 %vm522_vm0, %v6535_v11  ;;  %5681 = vmatprep.subr.mxu0 %v5902_v9 }
 0x9cf   : > { %5682 = vmatpush3.msra.mxu0 %v5046_v39  ;;  %5689 = vmatprep.mubr.msk.f32.mxu0 %vm5903_vm1, %v5902_v9 }
 0x9d0   : > { %5683 = vmatprep.subr.mxu0 %v5902_v9 }
 0x9d1   : > { %5684 = vmatpush3.msra.mxu0 %v5045_v40 }
 0x9d2   : > { %5685 = vmatprep.subr.mxu0 %v5902_v9 }
 0x9d3   : > { %5686 = vmatpush3.msra.mxu0 %v5044_v41 }
 0x9d4   : > { %5687 = vmatprep.subr.mxu0 %v5902_v9 }
 0x9d5   : > { %5688 = vmatpush3.msra.mxu0 %v5043_v42 }
 0x9d6   : > { %5690 = vmatmul.mubr.msk.f32.vlgmr.msra.gmra.mxu0 %vm522_vm0, %v6535_v11  ;;  %5703 = vmatprep.subr.mxu0 %v5902_v9 }
 0x9d7   : > { %5704 = vmatpush3.msra.mxu0 %v5054_v43  ;;  %5711 = vmatprep.mubr.msk.f32.mxu0 %vm5903_vm1, %v5902_v9 }
 0x9d8   : > { %5705 = vmatprep.subr.mxu0 %v5902_v9 }
 0x9d9   : > { %5706 = vmatpush3.msra.mxu0 %v5053_v44 }
 0x9da   : > { %5707 = vmatprep.subr.mxu0 %v5902_v9 }
 0x9db   : > { %5708 = vmatpush3.msra.mxu0 %v5052_v45 }
 0x9dc   : > { %5709 = vmatprep.subr.mxu0 %v5902_v9 }
 0x9dd   : > { %5710 = vmatpush3.msra.mxu0 %v5051_v46 }
 0x9de   : > { %5712 = vmatmul.mubr.msk.f32.vlgmr.msra.gmra.mxu0 %vm522_vm0, %v6535_v11  ;;  %5725 = vmatprep.subr.mxu0 %v5902_v9 }
 0x9df   : > { %5726 = vmatpush3.msra.mxu0 %v5062_v47  ;;  %5733 = vmatprep.mubr.msk.f32.mxu0 %vm5903_vm1, %v5902_v9 }
 0x9e0   : > { %5727 = vmatprep.subr.mxu0 %v5902_v9 }
 0x9e1   : > { %5728 = vmatpush3.msra.mxu0 %v5061_v48 }
 0x9e2   : > { %5729 = vmatprep.subr.mxu0 %v5902_v9 }
 0x9e3   : > { %5730 = vmatpush3.msra.mxu0 %v5060_v49 }
 0x9e4   : > { %5731 = vmatprep.subr.mxu0 %v5902_v9 }
 0x9e5   : > { %5732 = vmatpush3.msra.mxu0 %v5059_v51 }
 0x9e6   : > { %5734 = vmatmul.mubr.msk.f32.vlgmr.msra.gmra.mxu0 %vm522_vm0, %v6535_v11  ;;  %5746 = vmatprep.subr.mxu0 %v5902_v9 }
 0x9e7   : > { %5748 = vmatprep.mubr.msk.f32.mxu0 %vm5903_vm1, %v5902_v9 }
 0xa69   : > { %v2926_v54 = vpop.f32.mrf.mxu0  ;;  %v3206_v55 = vpop.f32.mrf.mxu1 }
 0xa6a   : > { %v2927_v56 = vadd.f32 %v5075_v52, %v2926_v54  ;;  %v3207_v57 = vadd.f32 %v5079_v53, %v3206_v55 }
 0xa6b   : > { %v5614_v58 = vpop.f32.mrf.mxu0  ;;  %v5658_v59 = vpop.f32.mrf.mxu1 }
 0xa6c   : > { %v3700_v60 = vmul.f32 0.35355338, %v2927_v56  ;;  %5737 = vmatpush3.xpose.msk.msra.mxu1 %vm1530_vm2, %v3207_v57 }
 0xa6d   : > { %5741 = vmatprep.subr.mxu1 %v5902_v9 }
 0xa6f   : > { %5739 = vmatmul.mubr.msk.f32.vlgmr.msra.gmra.mxu1 %vm1530_vm2, %v3700_v60 }
 0xa70   : > { %5743 = vmatprep.mubr.msk.f32.mxu1 %vm5903_vm1, %v5902_v9 }
 0xa72   : > { %v2996_v62 = vpop.f32.mrf.mxu0 }
 0xa73   : > { %v3346_v63 = vpop.f32.mrf.mxu1  ;;  %v2997_v19 = vadd.f32 %v5076_v17, %v2996_v62  ;;  %v5086_v17 = vld [vmem:[%s6987_s5 + $0x17] ss:$0 sm:$0xff] }
 0xa74   : > { %v3347_v0 = vadd.f32 %v5081_v61, %v3346_v63  ;;  %v5625_v1 = vpop.f32.mrf.mxu0 }
 0xa75   : > { %v5680_v3 = vpop.f32.mrf.mxu1  ;;  %v3701_v23 = vmul.f32 0.35355338, %v2997_v19 }
 0xa76   : > { %5747 = vmatpush3.xpose.msk.msra.mxu0 %vm1530_vm2, %v3347_v0 }
 0xa77   : > { %5756 = vmatprep.subr.mxu0 %v5902_v9 }
 0xa7c   : > { %v3066_v5 = vpop.f32.mrf.mxu0 }
 0xa7d   : > { %v3067_v6 = vadd.f32 %v5077_v4, %v3066_v5  ;;  %v3486_v8 = vpop.f32.mrf.mxu1 }
 0xa7e   : > { %v5636_v10 = vpop.f32.mrf.mxu0  ;;  %v3487_v13 = vadd.f32 %v5083_v7, %v3486_v8  ;;  %v5085_v8 = vld [vmem:[%s6987_s5 + $0x16] ss:$0 sm:$0xff] }
 0xa7f   : > { %v3702_v11 = vmul.f32 0.35355338, %v3067_v6  ;;  %v5702_v12 = vpop.f32.mrf.mxu1 }
 0xa81   : > { %5749 = vmatmul.mubr.msk.f32.vlgmr.msra.gmra.mxu0 %vm1530_vm2, %v3702_v11 }
 0xa82   : > { %5757 = vmatpush3.msra.mxu0 %v3487_v13  ;;  %5758 = vmatprep.mubr.msk.f32.mxu0 %vm5903_vm1, %v5902_v9 }
 0xa83   : > { %5766 = vmatprep.subr.mxu0 %v5902_v9 }
 0xa86   : > { %v3136_v2 = vpop.f32.mrf.mxu0 }
 0xa87   : > { %v6771_v14 = vpop.f32.mrf.mxu1  ;;  %v3137_v26 = vadd.f32 %v5078_v24, %v3136_v2  ;;  %v5112_v24 = vld [vmem:[%s6988_s6 + $0x28] sm:$0xff] }
 0xa88   : > { %v5647_v15 = vpop.f32.mrf.mxu0  ;;  %v3627_v12 = vadd.f32 %v5085_v8, %v6771_v14  ;;  %v5139_v8 = vld [vmem:[%s6994_s12 + $0xb8] sm:$0xff] }
 0xa89   : > { %v5724_v16 = vpop.f32.mrf.mxu1  ;;  %v3703_v30 = vmul.f32 0.35355338, %v3137_v26 }
 0xa8e   : > { %v3276_v20 = vpop.f32.mrf.mxu0 }
 0xa8f   : > { %v3277_v21 = vadd.f32 %v5080_v18, %v3276_v20 }
 0xa90   : > { %v5669_v22 = vpop.f32.mrf.mxu0 }
 0xa91   : > { %5742 = vmatpush3.xpose.msk.msra.mxu1 %vm1530_vm2, %v3277_v21 }
 0xa92   : > { %5751 = vmatprep.subr.mxu1 %v5902_v9 }
 0xa94   : > { %5744 = vmatmul.mubr.msk.f32.vlgmr.msra.gmra.mxu1 %vm1530_vm2, %v3701_v23  ;;  %v5111_v23 = vld [vmem:[%s6988_s6 + $0x20] sm:$0xff] }
 0xa95   : > { %5753 = vmatprep.mubr.msk.f32.mxu1 %vm5903_vm1, %v5902_v9 }
 0xa96   : > { %v3416_v27 = vpop.f32.mrf.mxu0 }
 0xa97   : > { %v3417_v28 = vadd.f32 %v5082_v25, %v3416_v27  ;;  %v5113_v25 = vld [vmem:[%s6988_s6 + $0x30] sm:$0xff] }
 0xa98   : > { %v5691_v29 = vpop.f32.mrf.mxu0 }
 0xa99   : > { %5752 = vmatpush3.xpose.msk.msra.mxu1 %vm1530_vm2, %v3417_v28 }
 0xa9a   : > { %5761 = vmatprep.subr.mxu1 %v5902_v9 }
 0xa9c   : > { %5754 = vmatmul.mubr.msk.f32.vlgmr.msra.gmra.mxu1 %vm1530_vm2, %v3703_v30  ;;  %v5114_v30 = vld [vmem:[%s6988_s6 + $0x38] sm:$0xff] }
 0xa9d   : > { %5763 = vmatprep.mubr.msk.f32.mxu1 %vm5903_vm1, %v5902_v9 }
 0xa9e   : > { %v3556_v32 = vpop.f32.mrf.mxu0 }
 0xa9f   : > { %v3557_v33 = vadd.f32 %v5084_v31, %v3556_v32 }
 0xaa0   : > { %v5713_v34 = vpop.f32.mrf.mxu0 }
 0xaa1   : > { %5762 = vmatpush3.msra.mxu1 %v3557_v33 }
 0xaa2   : > { %5771 = vmatprep.subr.mxu1 %v5902_v9 }
 0xaa6   : > { %v6799_v35 = vpop.f32.mrf.mxu0 }
 0xaa7   : > { %v3697_v20 = vadd.f32 %v5086_v17, %v6799_v35  ;;  %v5123_v17 = vld [vmem:[%s6990_s8 + $0x1] ss:$0 sm:$0xff] }
 0xaa8   : > { %v5735_v36 = vpop.f32.mrf.mxu0 }
 0xb2f   : > { %v3776_v37 = vpop.f32.mrf.mxu1 }
 0xb30   : > { %v4008_v38 = vsel %vm1530_vm2, %v3776_v37, -inf }
 0xb31   : > { %4009 = vmax.xlane.f32.xlu0 %v4008_v38  ;;  %v5740_v39 = vpop.f32.mrf.mxu1 }
 0xb41   : > { %v3928_v40 = vpop.f32.mrf.mxu0 }
 0xb42   : > { %v4014_v41 = vsel %vm1530_vm2, %v3928_v40, -inf }
 0xb43   : > { %4015 = vmax.xlane.f32.xlu0 %v4014_v41  ;;  %v5750_v42 = vpop.f32.mrf.mxu0 }
 0xb54   : > { %v3852_v43 = vpop.f32.mrf.mxu1 }
 0xb55   : > { %v4011_v44 = vsel %vm1530_vm2, %v3852_v43, -inf }
 0xb56   : > { %4012 = vmax.xlane.f32.xlu1 %v4011_v44  ;;  %v5745_v45 = vpop.f32.mrf.mxu1 }
 0xb5c   : > { %v4004_v46 = vpop.f32.mrf.mxu1 }
 0xb5d   : > { %v4017_v47 = vsel %vm1530_vm2, %v4004_v46, -inf }
 0xb5e   : > { %4018 = vmax.xlane.f32.xlu1 %v4017_v47  ;;  %v5755_v48 = vpop.f32.mrf.mxu1 }
 0xbba   : > { %v4010_v49 = vpop.xlane.xlu0 %4009 }
 0xbbb   : > { %v4020_v51 = vsub.f32 %v3776_v37, %v4010_v49 }
 0xbbd   : > { %v4024_v52 = vmul.f32 1.442695, %v4020_v51  ;;  %v5120_v51 = vld [vmem:[%s6989_s7 + $0x1] ss:$0 sm:$0xff] }
 0xbbf   : > { %5874 = vpow2.f32 %v4024_v52 }
 0xbcc   : > { %v5875_v53 = vpop.eup %5874  ;;  %v4016_v54 = vpop.xlane.xlu0 %4015 }
 0xbcd   : > { %v4022_v55 = vsub.f32 %v3928_v40, %v4016_v54  ;;  %v4032_v56 = vsel %vm1530_vm2, %v5875_v53, 0.0 }
 0xbce   : > { %4033 = vadd.xlane.f32.xlu0 %v4032_v56 }
 0xbcf   : > { %v4028_v57 = vmul.f32 1.442695, %v4022_v55 }
 0xbd1   : > { %5876 = vpow2.f32 %v4028_v57 }
 0xbde   : > { %v5877_v58 = vpop.eup %5876 }
 0xbdf   : > { %v4013_v59 = vpop.xlane.xlu1 %4012  ;;  %v4038_v60 = vsel %vm1530_vm2, %v5877_v58, 0.0 }
 0xbe0   : > { %v4021_v61 = vsub.f32 %v3852_v43, %v4013_v59  ;;  %4039 = vadd.xlane.f32.xlu0 %v4038_v60  ;;  %v5128_v60 = vld [vmem:[%s6992_s10 + $0x38] sm:$0xff] }
 0xbe2   : > { %v4026_v62 = vmul.f32 1.442695, %v4021_v61  ;;  %v5126_v61 = vld [vmem:[%s6992_s10 + $0x28] sm:$0xff] }
 0xbe4   : > { %5878 = vpow2.f32 %v4026_v62  ;;  %v5125_v62 = vld [vmem:[%s6992_s10 + $0x20] sm:$0xff] }
 0xbe7   : > { %v4019_v63 = vpop.xlane.xlu1 %4018 }
 0xbe8   : > { %v4023_v0 = vsub.f32 %v4004_v46, %v4019_v63  ;;  %v5147_v63 = vld [vmem:[%s6994_s12 + $0xf8] sm:$0xff] }
 0xbea   : > { %v4030_v1 = vmul.f32 1.442695, %v4023_v0  ;;  %v5146_v0 = vld [vmem:[%s6994_s12 + $0xf0] sm:$0xff] }
 0xbec   : > { %5880 = vpow2.f32 %v4030_v1  ;;  %v5145_v1 = vld [vmem:[%s6994_s12 + $0xe8] sm:$0xff] }
 0xbf1   : > { %v5879_v3 = vpop.eup %5878 }
 0xbf2   : > { %v4035_v4 = vsel %vm1530_vm2, %v5879_v3, 0.0 }
 0xbf3   : > { %4036 = vadd.xlane.f32.xlu1 %v4035_v4  ;;  %v5143_v4 = vld [vmem:[%s6994_s12 + $0xd8] sm:$0xff] }
 0xbf9   : > { %v5881_v5 = vpop.eup %5880 }
 0xbfa   : > { %v4041_v6 = vsel %vm1530_vm2, %v5881_v5, 0.0 }
 0xbfb   : > { %4042 = vadd.xlane.f32.xlu1 %v4041_v6  ;;  %v5141_v6 = vld [vmem:[%s6994_s12 + $0xc8] sm:$0xff] }
 0xc57   : > { %v4034_v7 = vpop.xlane.xlu0 %4033 }
 0xc58   : > { %5882 = vrcp.f32 %v4034_v7  ;;  %v5140_v7 = vld [vmem:[%s6994_s12 + $0xc0] sm:$0xff] }
 0xc65   : > { %v5883_v10 = vpop.eup %5882 }
 0xc66   : > { %v4048_v11 = vmul.f32 %v5883_v10, %v5875_v53  ;;  %v5138_v10 = vld [vmem:[%s6994_s12 + $0xb0] sm:$0xff] }
 0xc68   : > { %5759 = vmatmul.mubr.msk.f32.vlgmr.msra.gmra.mxu0 %vm1530_vm2, %v4048_v11  ;;  %v5137_v11 = vld [vmem:[%s6994_s12 + $0xa8] sm:$0xff] }
 0xc69   : > { %v4040_v13 = vpop.xlane.xlu0 %4039  ;;  %5767 = vmatpush3.msra.mxu0 %v3627_v12  ;;  %5768 = vmatprep.mubr.msk.f32.mxu0 %vm5903_vm1, %v5902_v9  ;;  %v5136_v12 = vld [vmem:[%s6994_s12 + $0xa0] sm:$0xff] }
 0xc6a   : > { %5884 = vrcp.f32 %v4040_v13  ;;  %5776 = vmatprep.subr.mxu0 %v5902_v9  ;;  %v5135_v13 = vld [vmem:[%s6994_s12 + $0x98] sm:$0xff] }
 0xc77   : > { %v5885_v2 = vpop.eup %5884 }
 0xc78   : > { %v4050_v15 = vmul.f32 %v5885_v2, %v5877_v58 }
 0xc7a   : > { %5769 = vmatmul.mubr.msk.f32.vlgmr.msra.gmra.mxu0 %vm1530_vm2, %v4050_v15 }
 0xc7b   : > { %5778 = vmatprep.mubr.msk.f32.mxu0 %vm5903_vm1, %v5902_v9  ;;  %5777 = vmatpush3.msra.mxu0 %v5111_v23  ;;  %v5133_v23 = vld [vmem:[%s6994_s12 + $0x88] sm:$0xff] }
 0xc7c   : > { %v4037_v16 = vpop.xlane.xlu1 %4036  ;;  %5786 = vmatprep.subr.mxu0 %v5902_v9 }
 0xc7d   : > { %5886 = vrcp.f32 %v4037_v16 }
 0xc84   : > { %v4043_v14 = vpop.xlane.xlu1 %4042 }
 0xc85   : > { %5888 = vrcp.f32 %v4043_v14 }
 0xc8a   : > { %v5887_v18 = vpop.eup %5886 }
 0xc8b   : > { %v4049_v19 = vmul.f32 %v5887_v18, %v5879_v3  ;;  %v5144_v3 = vld [vmem:[%s6994_s12 + $0xe0] sm:$0xff] }
 0xc8d   : > { %5764 = vmatmul.mubr.msk.f32.vlgmr.msra.gmra.mxu1 %vm1530_vm2, %v4049_v19  ;;  %v5124_v19 = vld [vmem:[%s6991_s9 + $0x1] ss:$0 sm:$0xff] }
 0xc8e   : > { %5772 = vmatpush3.msra.mxu1 %v3697_v20  ;;  %5773 = vmatprep.mubr.msk.f32.mxu1 %vm5903_vm1, %v5902_v9 }
 0xc8f   : > { %5781 = vmatprep.subr.mxu1 %v5902_v9 }
 0xc92   : > { %v5889_v21 = vpop.eup %5888 }
 0xc93   : > { %v4051_v22 = vmul.f32 %v5889_v21, %v5881_v5  ;;  %v5142_v5 = vld [vmem:[%s6994_s12 + $0xd0] sm:$0xff] }
 0xc95   : > { %5774 = vmatmul.mubr.msk.f32.vlgmr.msra.gmra.mxu1 %vm1530_vm2, %v4051_v22  ;;  %v5134_v22 = vld [vmem:[%s6994_s12 + $0x90] sm:$0xff] }
 0xc96   : > { %5783 = vmatprep.mubr.msk.f32.mxu1 %vm5903_vm1, %v5902_v9  ;;  %5782 = vmatpush3.msra.mxu1 %v5112_v24  ;;  %v5132_v24 = vld [vmem:[%s6994_s12 + $0x80] sm:$0xff] }
 0xc97   : > { %5791 = vmatprep.subr.mxu1 %v5902_v9 }
 0xd28   : > { %v4121_v26 = vpop.f32.mrf.mxu0 }
 0xd29   : > { %5779 = vmatmul.mubr.msk.f32.vlgmr.msra.gmra.mxu0 %vm1530_vm2, %v4121_v26 }
 0xd2a   : > { %v5760_v27 = vpop.f32.mrf.mxu0  ;;  %5787 = vmatpush3.msra.mxu0 %v5113_v25  ;;  %5788 = vmatprep.mubr.msk.f32.mxu0 %vm5903_vm1, %v5902_v9  ;;  %v5130_v25 = vld [vmem:[%s6993_s11 + $0x1] ss:$0 sm:$0xff] }
 0xd2b   : > { %5796 = vmatprep.subr.mxu0 %v5902_v9 }
 0xd3a   : > { %v4267_v28 = vpop.f32.mrf.mxu0 }
 0xd3b   : > { %5789 = vmatmul.mubr.msk.f32.vlgmr.msra.gmra.mxu0 %vm1530_vm2, %v4267_v28 }
 0xd3c   : > { %v5770_v29 = vpop.f32.mrf.mxu0  ;;  %5804 = vmatprep.mubr.msk.f32.mxu0 %vm5903_vm1, %v5902_v9  ;;  %5797 = vmatpush3.msra.mxu0 %v5128_v60 }
 0xd3d   : > { %5798 = vmatprep.subr.mxu0 %v5902_v9 }
 0xd4d   : > { %v4194_v31 = vpop.f32.mrf.mxu1 }
 0xd4e   : > { %5784 = vmatmul.mubr.msk.f32.vlgmr.msra.gmra.mxu1 %vm1530_vm2, %v4194_v31  ;;  %v5149_v31 = vld [vmem:[%s6995_s13 + $0x1] ss:$0 sm:$0xff] }
 0xd4f   : > { %v5765_v32 = vpop.f32.mrf.mxu1  ;;  %5792 = vmatpush3.msra.mxu1 %v5114_v30  ;;  %5793 = vmatprep.mubr.msk.f32.mxu1 %vm5903_vm1, %v5902_v9 }
 0xd50   : > { %5807 = vmatprep.subr.mxu1 %v5902_v9 }
 0xd55   : > { %v4340_v33 = vpop.f32.mrf.mxu1 }
 0xd56   : > { %5794 = vmatmul.mubr.msk.f32.vlgmr.msra.gmra.mxu1 %vm1530_vm2, %v4340_v33 }
 0xd57   : > { %v5775_v34 = vpop.f32.mrf.mxu1  ;;  %5839 = vmatprep.mubr.msk.f32.mxu1 %vm5903_vm1, %v5902_v9  ;;  %5808 = vmatpush3.msra.mxu1 %v5147_v63 }
 0xd58   : > { %5809 = vmatprep.subr.mxu1 %v5902_v9 }
 0xd59   : > { %5810 = vmatpush3.msra.mxu1 %v5146_v0 }
 0xd5a   : > { %5811 = vmatprep.subr.mxu1 %v5902_v9 }
 0xd5b   : > { %5812 = vmatpush3.msra.mxu1 %v5145_v1 }
 0xd5c   : > { %5813 = vmatprep.subr.mxu1 %v5902_v9 }
 0xd5d   : > { %5814 = vmatpush3.msra.mxu1 %v5144_v3 }
 0xd5e   : > { %5815 = vmatprep.subr.mxu1 %v5902_v9 }
 0xd5f   : > { %5816 = vmatpush3.msra.mxu1 %v5143_v4 }
 0xd60   : > { %5817 = vmatprep.subr.mxu1 %v5902_v9 }
 0xd61   : > { %5818 = vmatpush3.msra.mxu1 %v5142_v5 }
 0xd62   : > { %5819 = vmatprep.subr.mxu1 %v5902_v9 }
 0xd63   : > { %5820 = vmatpush3.msra.mxu1 %v5141_v6 }
 0xd64   : > { %5821 = vmatprep.subr.mxu1 %v5902_v9 }
 0xd65   : > { %5822 = vmatpush3.msra.mxu1 %v5140_v7 }
 0xd66   : > { %5823 = vmatprep.subr.mxu1 %v5902_v9 }
 0xd67   : > { %5824 = vmatpush3.msra.mxu1 %v5139_v8 }
 0xd68   : > { %5825 = vmatprep.subr.mxu1 %v5902_v9 }
 0xd69   : > { %5826 = vmatpush3.msra.mxu1 %v5138_v10 }
 0xd6a   : > { %5827 = vmatprep.subr.mxu1 %v5902_v9 }
 0xd6b   : > { %5828 = vmatpush3.msra.mxu1 %v5137_v11 }
 0xd6c   : > { %5829 = vmatprep.subr.mxu1 %v5902_v9 }
 0xd6d   : > { %5830 = vmatpush3.msra.mxu1 %v5136_v12 }
 0xd6e   : > { %5831 = vmatprep.subr.mxu1 %v5902_v9 }
 0xd6f   : > { %5832 = vmatpush3.msra.mxu1 %v5135_v13 }
 0xd70   : > { %5833 = vmatprep.subr.mxu1 %v5902_v9 }
 0xd71   : > { %5834 = vmatpush3.msra.mxu1 %v5134_v22 }
 0xd72   : > { %5835 = vmatprep.subr.mxu1 %v5902_v9 }
 0xd73   : > { %5836 = vmatpush3.msra.mxu1 %v5133_v23 }
 0xd74   : > { %5837 = vmatprep.subr.mxu1 %v5902_v9 }
 0xd75   : > { %5838 = vmatpush3.msra.mxu1 %v5132_v24 }
 0xde9   : > { %v4418_v35 = vpop.f32.mrf.mxu0 }
 0xdea   : > { %v4641_v42 = vsel %vm522_vm0, %v4418_v35, 0.0 }
 0xdeb   : > { %v5780_v36 = vpop.f32.mrf.mxu0 }
 0xdfb   : > { %v4564_v37 = vpop.f32.mrf.mxu0 }
 0xdfc   : > { %v4644_v44 = vsel %vm522_vm0, %v4564_v37, 0.0 }
 0xdfd   : > { %v5790_v38 = vpop.f32.mrf.mxu0 }
 0xe0e   : > { %v4491_v39 = vpop.f32.mrf.mxu1 }
 0xe0f   : > { %v4642_v40 = vsel %vm522_vm0, %v4491_v39, 0.0 }
 0xe10   : > { %v5785_v41 = vpop.f32.mrf.mxu1  ;;  %v4643_v43 = vadd.f32 %v4642_v40, %v4641_v42 }
 0xe12   : > { %v4645_v46 = vadd.f32 %v4644_v44, %v4643_v43  ;;  %v5150_v44 = vld [vmem:[%s6996_s14] ss:$0 sm:$0xff] }
 0xe16   : > { %v4637_v45 = vpop.f32.mrf.mxu1 }
 0xe17   : > { %v4646_v47 = vsel %vm522_vm0, %v4637_v45, 0.0 }
 0xe18   : > { %v4647_v48 = vadd.f32 %v4646_v47, %v4645_v46  ;;  %v5795_v49 = vpop.f32.mrf.mxu1  ;;  %v5151_v46 = vld [vmem:[%s6997_s15] ss:$0 sm:$0xff] }
 0xe1a   : > { %v4648_v52 = vadd.f32 %v4647_v48, %v6491_v50  ;;  %v5127_v50 = vld [vmem:[%s6992_s10 + $0x30] sm:$0xff] }
 0xe1b   : > { %5799 = vmatpush3.msra.mxu0 %v5127_v50 }
 0xe1c   : > { %v6867_v53 = vadd.f32 %v5120_v51, %v4648_v52  ;;  %5800 = vmatprep.subr.mxu0 %v5902_v9 }
 0xe1d   : > { %5801 = vmatpush3.msra.mxu0 %v5126_v61 }
 0xe1e   : > { %v4662_v54 = vsel %vm522_vm0, %v6867_v53, 0.0  ;;  %5802 = vmatprep.subr.mxu0 %v5902_v9 }
 0xe1f   : > { %4663 = vadd.xlane.f32.xlu0 %v4662_v54  ;;  %5803 = vmatpush3.msra.mxu0 %v5125_v62 }
 0xea8   : > { %v4664_v55 = vpop.xlane.xlu0 %4663 }
 0xea9   : > { %v4665_v56 = vmul.f32 0.03125, %v4664_v55 }
 0xeab   : > { %v4666_v57 = vsub.f32 %v6867_v53, %v4665_v56 }
 0xead   : > { %v4667_v58 = vmul.f32 %v4666_v57, %v4666_v57 }
 0xeaf   : > { %v4668_v59 = vsel %vm522_vm0, %v4667_v58, 0.0 }
 0xeb0   : > { %4669 = vadd.xlane.f32.xlu1 %v4668_v59 }
 0xf39   : > { %v4670_v2 = vpop.xlane.xlu1 %4669 }
 0xf3a   : > { %v4671_v15 = vmul.f32 0.03125, %v4670_v2 }
 0xf3c   : > { %v4672_v16 = vadd.f32 1e-05, %v4671_v15 }
 0xf3e   : > { %5890 = vrsqrt.f32 %v4672_v16 }
 0xf4b   : > { %v5891_v14 = vpop.eup %5890 }
 0xf4c   : > { %v4674_v18 = vmul.f32 %v5891_v14, %v4666_v57 }
 0xf4e   : > { %v4681_v20 = vmul.f32 %v5123_v17, %v4674_v18 }
 0xf50   : > { %v4688_v21 = vadd.f32 %v5124_v19, %v4681_v20 }
 0xf52   : > { %5805 = vmatmul.mubr.msk.f32.vlgmr.msra.gmra.mxu0 %vm522_vm0, %v4688_v21 }
0x1012   : > { %v4771_v26 = vpop.f32.mrf.mxu0 }
0x1013   : > { %v4772_v27 = vadd.f32 %v5130_v25, %v4771_v26 }
0x1014   : > { %v5806_v28 = vpop.f32.mrf.mxu0 }
0x1015   : > { %v4775_v29 = vmax.f32 %v4772_v27, 0.0 }
0x1017   : > { %5840 = vmatmul.mubr.f32.vlgmr.msra.gmra.mxu1 %v4775_v29 }
0x10d7   : > { %v4859_v30 = vpop.f32.mrf.mxu1 }
0x10d8   : > { %v4863_v32 = vadd.f32 %v4859_v30, %v6867_v53 }
0x10d9   : > { %v5841_v33 = vpop.f32.mrf.mxu1 }
0x10da   : > { %v4872_v34 = vadd.f32 %v5149_v31, %v4863_v32 }
0x10dc   : > { %v4875_v9 = vsel %vm522_vm0, %v4872_v34, 0.0 }
0x10dd   : > { %4876 = vadd.xlane.f32.xlu0 %v4875_v9 }
0x1166   : > { %v4877_v35 = vpop.xlane.xlu0 %4876 }
0x1167   : > { %v4878_v36 = vmul.f32 0.03125, %v4877_v35 }
0x1169   : > { %v4879_v37 = vsub.f32 %v4872_v34, %v4878_v36 }
0x116b   : > { %v4880_v38 = vmul.f32 %v4879_v37, %v4879_v37 }
0x116d   : > { %v4881_v39 = vsel %vm522_vm0, %v4880_v38, 0.0 }
0x116e   : > { %4882 = vadd.xlane.f32.xlu1 %v4881_v39 }
0x11f7   : > { %v4883_v40 = vpop.xlane.xlu1 %4882 }
0x11f8   : > { %v4884_v41 = vmul.f32 0.03125, %v4883_v40 }
0x11fa   : > { %v4885_v42 = vadd.f32 1e-05, %v4884_v41 }
0x11fc   : > { %5892 = vrsqrt.f32 %v4885_v42 }
0x1209   : > { %v5893_v43 = vpop.eup %5892 }
0x120a   : > { %v4887_v45 = vmul.f32 %v5893_v43, %v4879_v37 }
0x120c   : > { %v4894_v47 = vmul.f32 %v5150_v44, %v4887_v45 }
0x120e   : > { %v4901_v48 = vadd.f32 %v5151_v46, %v4894_v47 }
0x1210   : > { %4902 = vst.msk [vmem:[%s516_s28] sm:$0xff] %vm522_vm0, %v4901_v48 }
0x1211 PF: > { %s26_s21 = sadd.s32 1, %s5900_s21  }
0x1212   : > { %p23_p4 = scmp.ge.s32.totalorder %s26_s21, 4  }
0x1214   :  { %25 = sbr.rel (!%p23_p4) target bundleno = 2 (0x2), region = 126 }

</bundles_post_ra>
